<compile_context>
chip_gen: v7x
topology: tpu7x:2x2x1
jax: 0.10.0
libtpu: 0.0.40
codegen_flags: <defaults>
</compile_context>

<pallas_src>
import functools

import jax
import jax.numpy as jnp
from jax.experimental import pallas as pl
from jax.experimental.pallas import tpu as pltpu

LANES = 128
_BN_EPS = 1e-5
_LEAKY_SLOPE = 0.1


def _round_up(v, m):
    return ((v + m - 1) // m) * m


def _node_pad_multiple():
    """Pad the node axis to a full MXU step: 128 on <=v5, 256 on v6e/v7x."""
    try:
        kind = jax.devices()[0].device_kind.lower()
    except Exception:
        return 128
    for tag in ("v2", "v3", "v4", "v5"):
        if tag in kind:
            return 128
    return 256


def _vmem_capacity_bytes():
    try:
        info = pltpu.get_tpu_info()
        cap = getattr(info, "vmem_capacity_bytes", None)
        if cap:
            return int(cap)
    except Exception:
        pass
    return 128 << 20


def _safe_pow(x, p):
    """x ** p for x >= 0 (0 ** p := 0), via EUP exp/log; p is a scalar.

    TODO(synk): learnable p <= 0 diverges from torch.pow (0**neg = inf, p == 0
    divides by zero in the outer 1/p); exact at the p = 1 initialization.
    """
    safe = jnp.where(x > 0, x, 1.0)
    return jnp.where(x > 0, jnp.exp(p * jnp.log(safe)), 0.0)


def gcn_decoder_kernel(a_hbm_ref, x_ref, rowsum_ref,
                       w1_ref, b1_ref, g1_ref, be1_ref,
                       w2_ref, b2_ref, g2_ref, be2_ref,
                       w3_ref, b3_ref, g3_ref, be3_ref,
                       wp_ref, bp_ref, p_ref,
                       out_ref,
                       a_vmem, dma_sem,
                       *, n_real, agg_first):
    """Whole GCNDecoder forward for one graph, fully resident in VMEM.

    a_hbm_ref : [Np, Np] bf16 (HBM)  normalized adjacency, padded rows/cols 0
    x_ref     : [Np, F0p] bf16       node features (zero padded)
    rowsum_ref: [Np, 1] f32          A_hat @ 1 (pre-aggregation bias carry)
    w*        : [Finp, Foutp] bf16   GCN Linear weights (zero padded)
    b*/g*/be* : [1, Foutp] f32       Linear bias / BN gamma / BN beta
    wp/bp     : [Fep, Cp] f32 / [1, Cp] f32   graph prediction head
    p_ref     : (1,) f32 in SMEM     learnable PowerMean exponent
    out_ref   : [1, Cp] f32          class logits (padded columns stay zero)
    """
    # Exactly one VMEM-resident copy of A_hat: manual HBM -> VMEM DMA.
    cp = pltpu.make_async_copy(a_hbm_ref, a_vmem, dma_sem)
    cp.start()
    cp.wait()
    a_bf = a_vmem[...]                                    # [Np, Np] bf16

    n_pad = a_bf.shape[0]
    inv_n = 1.0 / n_real

    row_ids = jax.lax.broadcasted_iota(jnp.int32, (n_pad, 1), 0)
    node_mask = row_ids < n_real                          # [Np, 1] bool

    rowsum = rowsum_ref[...]                              # [Np, 1] f32

    def gcn_layer(h_bf, w_ref, b_ref, g_ref, be_ref, aggregate_first):
        w_bf = w_ref[...]                                 # bf16
        b = b_ref[...]                                    # [1, Fout] f32
        if aggregate_first:
            # Fin < Fout (padded): O(N^2) contraction on the narrow side.
            # A @ (xW + 1 b^T) = (A @ x) W + (A @ 1) b^T.
            agg = jnp.dot(a_bf, h_bf, preferred_element_type=jnp.float32)
            z = jnp.dot(agg.astype(jnp.bfloat16), w_bf,
                        preferred_element_type=jnp.float32) + rowsum * b
        else:
            lin = jnp.dot(h_bf, w_bf, preferred_element_type=jnp.float32) + b
            z = jnp.dot(a_bf, lin.astype(jnp.bfloat16),
                        preferred_element_type=jnp.float32)
        # z has exact zeros in padded node rows and padded feature columns.
        # One-pass BatchNorm1d (training-mode, biased variance) over real rows.
        s1 = jnp.sum(z, axis=0, keepdims=True)
        s2 = jnp.sum(z * z, axis=0, keepdims=True)
        mean = s1 * inv_n
        var = jnp.maximum(s2 * inv_n - mean * mean, 0.0)
        y = (z - mean) * jax.lax.rsqrt(var + _BN_EPS) * g_ref[...] + be_ref[...]
        y = jnp.where(y > 0, y, _LEAKY_SLOPE * y)          # LeakyReLU(0.1)
        y = jnp.where(node_mask, y, 0.0)                   # re-zero padded rows
        return y.astype(jnp.bfloat16)                      # bf16 inter-layer act

    h1 = gcn_layer(x_ref[...], w1_ref, b1_ref, g1_ref, be1_ref, agg_first[0])
    h2 = gcn_layer(h1, w2_ref, b2_ref, g2_ref, be2_ref, agg_first[1])
    h3 = gcn_layer(h2, w3_ref, b3_ref, g3_ref, be3_ref, agg_first[2])

    # PowerMeanAggregation(learn=True): clamp(x,0,100)^p -> mean over nodes ->
    # clamp(.,0,100)^(1/p), matching the PyG learnable-p code path.
    p = p_ref[0]
    xc = jnp.clip(h3.astype(jnp.float32), 0.0, 100.0)      # padded rows stay 0
    pooled = jnp.sum(_safe_pow(xc, p), axis=0, keepdims=True) * inv_n
    pooled = _safe_pow(jnp.clip(pooled, 0.0, 100.0), 1.0 / p)   # [1, Fep]

    # graph_prediction: Linear(embedding_dim, num_class), f32 for the logits.
    logits = jnp.dot(pooled, wp_ref[...],
                     preferred_element_type=jnp.float32) + bp_ref[...]
    out_ref[...] = logits.astype(out_ref.dtype)


def build_norm_adj(edge_index, num_nodes, n_pad):
    """Dense D^-1/2 (A + I) D^-1/2, zero-padded to [n_pad, n_pad], f32."""
    row, col = edge_index[0], edge_index[1]
    loops = jnp.arange(num_nodes, dtype=edge_index.dtype)
    row = jnp.concatenate([row, loops])
    col = jnp.concatenate([col, loops])
    deg = jnp.zeros((num_nodes,), jnp.float32).at[col].add(1.0)
    deg_inv_sqrt = jax.lax.rsqrt(deg)                      # deg >= 1 (self loops)
    norm = deg_inv_sqrt[row] * deg_inv_sqrt[col]
    a_hat = jnp.zeros((n_pad, n_pad), jnp.float32).at[col, row].add(norm)
    return a_hat


def _pad2(a, r, c, dtype=jnp.float32):
    a = a.astype(jnp.float32)
    return jnp.pad(a, ((0, r - a.shape[0]), (0, c - a.shape[1]))).astype(dtype)


def _pad_row(v, c):
    v = v.astype(jnp.float32).reshape(1, -1)
    return jnp.pad(v, ((0, 0), (0, c - v.shape[1])))


@functools.partial(jax.jit, static_argnames=("node_num",))
def gcn_decoder_forward(x, edge_index, params, node_num):
    input_dim = params["w1"].shape[0]
    hidden_dim = params["w1"].shape[1]
    embedding_dim = params["w3"].shape[1]
    num_class = params["wp"].shape[1]

    n_pad = _round_up(node_num, _node_pad_multiple())
    f0 = _round_up(input_dim, LANES)
    fh = _round_up(hidden_dim, LANES)
    fe = _round_up(embedding_dim, LANES)
    fc = _round_up(num_class, LANES)

    a_hat_f32 = build_norm_adj(edge_index, node_num, n_pad)
    rowsum = jnp.sum(a_hat_f32, axis=1, keepdims=True)      # [Np, 1] = A_hat @ 1
    a_hat = a_hat_f32.astype(jnp.bfloat16)

    x_p = _pad2(x, n_pad, f0, jnp.bfloat16)

    w1 = _pad2(params["w1"], f0, fh, jnp.bfloat16); b1 = _pad_row(params["b1"], fh)
    g1 = _pad_row(params["gamma1"], fh); be1 = _pad_row(params["beta1"], fh)
    w2 = _pad2(params["w2"], fh, fh, jnp.bfloat16); b2 = _pad_row(params["b2"], fh)
    g2 = _pad_row(params["gamma2"], fh); be2 = _pad_row(params["beta2"], fh)
    w3 = _pad2(params["w3"], fh, fe, jnp.bfloat16); b3 = _pad_row(params["b3"], fe)
    g3 = _pad_row(params["gamma3"], fe); be3 = _pad_row(params["beta3"], fe)
    wp = _pad2(params["wp"], fe, fc); bp = _pad_row(params["bp"], fc)
    p = params["p"].astype(jnp.float32).reshape(1,)

    # Aggregate-first only when it shrinks the O(N^2)-scaled contraction width
    # AFTER padding (equal padded widths -> lin-first, no rowsum correction).
    padded_dims = ((f0, fh), (fh, fh), (fh, fe))
    agg_first = tuple(fi < fo for fi, fo in padded_dims)

    vmem_operands = (x_p, rowsum,
                     w1, b1, g1, be1,
                     w2, b2, g2, be2,
                     w3, b3, g3, be3,
                     wp, bp)

    spec = lambda shape: pl.BlockSpec(shape, lambda: tuple(0 for _ in shape))
    in_specs = ([pl.BlockSpec(memory_space=pl.ANY)]          # A_hat stays in HBM
                + [spec(op.shape) for op in vmem_operands]
                + [pl.BlockSpec(memory_space=pltpu.MemorySpace.SMEM)])  # p scalar

    # Scoped VMEM limit from the actual residents (A_hat scratch + VMEM inputs
    # + f32 intermediates), floor 16 MiB, cap at ~80% of physical VMEM.
    maxf = max(f0, fh, fe, fc)
    resident = n_pad * n_pad * 2                             # A_hat VMEM scratch
    resident += sum(int(op.size) * op.dtype.itemsize for op in vmem_operands)
    resident += 8 * n_pad * maxf * 4                         # f32/bf16 temps
    cap = int(0.8 * _vmem_capacity_bytes())
    vmem_limit = int(min(max(2 * resident + (4 << 20), 16 << 20), cap))

    kernel = functools.partial(gcn_decoder_kernel,
                               n_real=node_num, agg_first=agg_first)

    logits_pad = pl.pallas_call(
        kernel,
        out_shape=jax.ShapeDtypeStruct((1, fc), jnp.float32),
        grid_spec=pltpu.PrefetchScalarGridSpec(
            num_scalar_prefetch=0,
            grid=(),
            in_specs=in_specs,
            out_specs=spec((1, fc)),
            scratch_shapes=[pltpu.VMEM((n_pad, n_pad), jnp.bfloat16),
                            pltpu.SemaphoreType.DMA],
        ),
        compiler_params=pltpu.CompilerParams(vmem_limit_bytes=vmem_limit),
    )(a_hat, *vmem_operands, p)

    logits = logits_pad[:, :num_class]
    ypred = jnp.argmax(logits, axis=1)
    return logits, ypred


def init_params(key, input_dim, hidden_dim, embedding_dim, num_class):
    ks = jax.random.split(key, 8)

    def linear(kw, kb, fin, fout):
        bound = 1.0 / (fin ** 0.5)
        w = jax.random.uniform(kw, (fin, fout), jnp.float32, -bound, bound)
        b = jax.random.uniform(kb, (fout,), jnp.float32, -bound, bound)
        return w, b

    w1, b1 = linear(ks[0], ks[1], input_dim, hidden_dim)
    w2, b2 = linear(ks[2], ks[3], hidden_dim, hidden_dim)
    w3, b3 = linear(ks[4], ks[5], hidden_dim, embedding_dim)
    wp, bp = linear(ks[6], ks[7], embedding_dim, num_class)
    return {
        "w1": w1, "b1": b1,
        "gamma1": jnp.ones((hidden_dim,), jnp.float32),
        "beta1": jnp.zeros((hidden_dim,), jnp.float32),
        "w2": w2, "b2": b2,
        "gamma2": jnp.ones((hidden_dim,), jnp.float32),
        "beta2": jnp.zeros((hidden_dim,), jnp.float32),
        "w3": w3, "b3": b3,
        "gamma3": jnp.ones((embedding_dim,), jnp.float32),
        "beta3": jnp.zeros((embedding_dim,), jnp.float32),
        "wp": wp, "bp": bp,
        "p": jnp.ones((1,), jnp.float32),   # PowerMeanAggregation(learn=True), p=1
    }


if __name__ == "__main__":
    key = jax.random.PRNGKey(0)
    k_x, k_p = jax.random.split(key)

    node_num = 16
    input_dim = 8
    hidden_dim = 32
    embedding_dim = 16
    num_class = 4

    x = jax.random.normal(k_x, (node_num, input_dim), jnp.float32)
    # Deterministic ring graph (both directions).
    src = jnp.arange(node_num, dtype=jnp.int32)
    dst = (src + 1) % node_num
    edge_index = jnp.stack([jnp.concatenate([src, dst]),
                            jnp.concatenate([dst, src])], axis=0)

    params = init_params(k_p, input_dim, hidden_dim, embedding_dim, num_class)

    logits, ypred = gcn_decoder_forward(x, edge_index, params, node_num)
    jax.block_until_ready((logits, ypred))
    assert logits.shape == (1, num_class)
    assert ypred.shape == (1,)
    print("KERNEL_OK")
</pallas_src>

<mosaic_0001>
module attributes {stable_mosaic.version = 11 : i64} {
  func.func private @main(%arg0: i32) attributes {dimension_semantics = [#tpu.dimension_semantics<core_parallel>], iteration_bounds = array<i64: 2>, tpu.core_type = #tpu.core_type<sc_scalar_subcore>, window_params = []} {
    return
  }
}

module attributes {stable_mosaic.version = 11 : i64} {
  func.func private @main(%arg0: i32) attributes {dimension_semantics = [#tpu.dimension_semantics<core_parallel>], iteration_bounds = array<i64: 2>, tpu.core_type = #tpu.core_type<sc_scalar_subcore>, window_params = []} {
    return
  }
}

module attributes {stable_mosaic.version = 11 : i64} {
  func.func @gcn_decoder_kernel(%arg0: memref<256x256xbf16, #tpu.memory_space<any>>, %arg1: memref<256x128xbf16, #tpu.memory_space<vmem>>, %arg2: memref<256x1xf32, #tpu.memory_space<vmem>>, %arg3: memref<128x128xbf16, #tpu.memory_space<vmem>>, %arg4: memref<1x128xf32, #tpu.memory_space<vmem>>, %arg5: memref<1x128xf32, #tpu.memory_space<vmem>>, %arg6: memref<1x128xf32, #tpu.memory_space<vmem>>, %arg7: memref<128x128xbf16, #tpu.memory_space<vmem>>, %arg8: memref<1x128xf32, #tpu.memory_space<vmem>>, %arg9: memref<1x128xf32, #tpu.memory_space<vmem>>, %arg10: memref<1x128xf32, #tpu.memory_space<vmem>>, %arg11: memref<128x128xbf16, #tpu.memory_space<vmem>>, %arg12: memref<1x128xf32, #tpu.memory_space<vmem>>, %arg13: memref<1x128xf32, #tpu.memory_space<vmem>>, %arg14: memref<1x128xf32, #tpu.memory_space<vmem>>, %arg15: memref<128x128xf32, #tpu.memory_space<vmem>>, %arg16: memref<1x128xf32, #tpu.memory_space<vmem>>, %arg17: memref<1xf32, #tpu.memory_space<smem>>, %arg18: memref<1x128xf32, #tpu.memory_space<vmem>>, %arg19: memref<256x256xbf16, #tpu.memory_space<vmem>>, %arg20: memref<!tpu.dma_semaphore, #tpu.memory_space<semaphore_mem>>) attributes {dimension_semantics = [], scalar_prefetch = 0 : i64, scratch_operands = 2 : i64, tpu.core_type = #tpu.core_type<tc>} {
    tpu.enqueue_dma source(%arg0 : memref<256x256xbf16, #tpu.memory_space<any>>) target(%arg19 : memref<256x256xbf16, #tpu.memory_space<vmem>>) target_semaphore(%arg20 : memref<!tpu.dma_semaphore, #tpu.memory_space<semaphore_mem>>)
    tpu.wait_dma2 semaphore(%arg20 : memref<!tpu.dma_semaphore, #tpu.memory_space<semaphore_mem>>) src(%arg0 : memref<256x256xbf16, #tpu.memory_space<any>>) dst(%arg19 : memref<256x256xbf16, #tpu.memory_space<vmem>>)
    %c0 = arith.constant 0 : index
    %c0_0 = arith.constant 0 : index
    %0 = vector.load %arg19[%c0, %c0_0] : memref<256x256xbf16, #tpu.memory_space<vmem>>, vector<256x256xbf16>
    %1 = tpu.iota {dimensions = array<i32: 0>} : vector<256x1xi32>
    %c16_i32 = arith.constant 16 : i32
    %2 = vector.broadcast %c16_i32 : i32 to vector<256x1xi32>
    %3 = arith.cmpi slt, %1, %2 : vector<256x1xi32>
    %c0_1 = arith.constant 0 : index
    %c0_2 = arith.constant 0 : index
    %4 = vector.load %arg1[%c0_1, %c0_2] : memref<256x128xbf16, #tpu.memory_space<vmem>>, vector<256x128xbf16>
    %c0_3 = arith.constant 0 : index
    %c0_4 = arith.constant 0 : index
    %5 = vector.load %arg3[%c0_3, %c0_4] : memref<128x128xbf16, #tpu.memory_space<vmem>>, vector<128x128xbf16>
    %c0_5 = arith.constant 0 : index
    %c0_6 = arith.constant 0 : index
    %6 = vector.load %arg4[%c0_5, %c0_6] : memref<1x128xf32, #tpu.memory_space<vmem>>, vector<1x128xf32>
    %cst = arith.constant dense<0.000000e+00> : vector<256x128xf32>
    %7 = tpu.matmul %4, %5, %cst {dimension_numbers = #tpu.dot_dimension_numbers<[1], [0], [0], [1], [0, 0, 1, 1], [], []>} : vector<256x128xbf16>, vector<128x128xbf16>, vector<256x128xf32> -> vector<256x128xf32>
    %8 = vector.broadcast %6 : vector<1x128xf32> to vector<256x128xf32>
    %9 = arith.addf %7, %8 : vector<256x128xf32>
    %10 = arith.truncf %9 : vector<256x128xf32> to vector<256x128xbf16>
    %cst_7 = arith.constant dense<0.000000e+00> : vector<256x128xf32>
    %11 = tpu.matmul %0, %10, %cst_7 {dimension_numbers = #tpu.dot_dimension_numbers<[1], [0], [0], [1], [0, 0, 1, 1], [], []>} : vector<256x256xbf16>, vector<256x128xbf16>, vector<256x128xf32> -> vector<256x128xf32>
    %cst_8 = arith.constant dense<0.000000e+00> : vector<128xf32>
    %12 = vector.multi_reduction <add>, %11, %cst_8 [0] : vector<256x128xf32> to vector<128xf32>
    %13 = vector.shape_cast %12 : vector<128xf32> to vector<1x128xf32>
    %14 = arith.mulf %11, %11 : vector<256x128xf32>
    %cst_9 = arith.constant dense<0.000000e+00> : vector<128xf32>
    %15 = vector.multi_reduction <add>, %14, %cst_9 [0] : vector<256x128xf32> to vector<128xf32>
    %16 = vector.shape_cast %15 : vector<128xf32> to vector<1x128xf32>
    %cst_10 = arith.constant 6.250000e-02 : f32
    %17 = vector.broadcast %cst_10 : f32 to vector<1x128xf32>
    %18 = arith.mulf %13, %17 : vector<1x128xf32>
    %cst_11 = arith.constant 6.250000e-02 : f32
    %19 = vector.broadcast %cst_11 : f32 to vector<1x128xf32>
    %20 = arith.mulf %16, %19 : vector<1x128xf32>
    %21 = arith.mulf %18, %18 : vector<1x128xf32>
    %22 = arith.subf %20, %21 : vector<1x128xf32>
    %cst_12 = arith.constant 0.000000e+00 : f32
    %23 = vector.broadcast %cst_12 : f32 to vector<1x128xf32>
    %24 = arith.maximumf %22, %23 : vector<1x128xf32>
    %25 = vector.broadcast %18 : vector<1x128xf32> to vector<256x128xf32>
    %26 = arith.subf %11, %25 : vector<256x128xf32>
    %cst_13 = arith.constant 9.99999974E-6 : f32
    %27 = vector.broadcast %cst_13 : f32 to vector<1x128xf32>
    %28 = arith.addf %24, %27 : vector<1x128xf32>
    %29 = math.rsqrt %28 : vector<1x128xf32>
    %30 = vector.broadcast %29 : vector<1x128xf32> to vector<256x128xf32>
    %31 = arith.mulf %26, %30 : vector<256x128xf32>
    %c0_14 = arith.constant 0 : index
    %c0_15 = arith.constant 0 : index
    %32 = vector.load %arg5[%c0_14, %c0_15] : memref<1x128xf32, #tpu.memory_space<vmem>>, vector<1x128xf32>
    %33 = vector.broadcast %32 : vector<1x128xf32> to vector<256x128xf32>
    %34 = arith.mulf %31, %33 : vector<256x128xf32>
    %c0_16 = arith.constant 0 : index
    %c0_17 = arith.constant 0 : index
    %35 = vector.load %arg6[%c0_16, %c0_17] : memref<1x128xf32, #tpu.memory_space<vmem>>, vector<1x128xf32>
    %36 = vector.broadcast %35 : vector<1x128xf32> to vector<256x128xf32>
    %37 = arith.addf %34, %36 : vector<256x128xf32>
    %cst_18 = arith.constant 0.000000e+00 : f32
    %38 = vector.broadcast %cst_18 : f32 to vector<256x128xf32>
    %39 = arith.cmpf ogt, %37, %38 : vector<256x128xf32>
    %cst_19 = arith.constant 1.000000e-01 : f32
    %40 = vector.broadcast %cst_19 : f32 to vector<256x128xf32>
    %41 = arith.mulf %40, %37 : vector<256x128xf32>
    %42 = arith.select %39, %37, %41 : vector<256x128xi1>, vector<256x128xf32>
    %cst_20 = arith.constant 0.000000e+00 : f32
    %43 = vector.shape_cast %3 : vector<256x1xi1> to vector<256x1xi1>
    %44 = vector.broadcast %43 : vector<256x1xi1> to vector<256x128xi1>
    %45 = vector.broadcast %cst_20 : f32 to vector<256x128xf32>
    %46 = arith.select %44, %42, %45 : vector<256x128xi1>, vector<256x128xf32>
    %47 = arith.truncf %46 : vector<256x128xf32> to vector<256x128xbf16>
    %c0_21 = arith.constant 0 : index
    %c0_22 = arith.constant 0 : index
    %48 = vector.load %arg7[%c0_21, %c0_22] : memref<128x128xbf16, #tpu.memory_space<vmem>>, vector<128x128xbf16>
    %c0_23 = arith.constant 0 : index
    %c0_24 = arith.constant 0 : index
    %49 = vector.load %arg8[%c0_23, %c0_24] : memref<1x128xf32, #tpu.memory_space<vmem>>, vector<1x128xf32>
    %cst_25 = arith.constant dense<0.000000e+00> : vector<256x128xf32>
    %50 = tpu.matmul %47, %48, %cst_25 {dimension_numbers = #tpu.dot_dimension_numbers<[1], [0], [0], [1], [0, 0, 1, 1], [], []>} : vector<256x128xbf16>, vector<128x128xbf16>, vector<256x128xf32> -> vector<256x128xf32>
    %51 = vector.broadcast %49 : vector<1x128xf32> to vector<256x128xf32>
    %52 = arith.addf %50, %51 : vector<256x128xf32>
    %53 = arith.truncf %52 : vector<256x128xf32> to vector<256x128xbf16>
    %cst_26 = arith.constant dense<0.000000e+00> : vector<256x128xf32>
    %54 = tpu.matmul %0, %53, %cst_26 {dimension_numbers = #tpu.dot_dimension_numbers<[1], [0], [0], [1], [0, 0, 1, 1], [], []>} : vector<256x256xbf16>, vector<256x128xbf16>, vector<256x128xf32> -> vector<256x128xf32>
    %cst_27 = arith.constant dense<0.000000e+00> : vector<128xf32>
    %55 = vector.multi_reduction <add>, %54, %cst_27 [0] : vector<256x128xf32> to vector<128xf32>
    %56 = vector.shape_cast %55 : vector<128xf32> to vector<1x128xf32>
    %57 = arith.mulf %54, %54 : vector<256x128xf32>
    %cst_28 = arith.constant dense<0.000000e+00> : vector<128xf32>
    %58 = vector.multi_reduction <add>, %57, %cst_28 [0] : vector<256x128xf32> to vector<128xf32>
    %59 = vector.shape_cast %58 : vector<128xf32> to vector<1x128xf32>
    %cst_29 = arith.constant 6.250000e-02 : f32
    %60 = vector.broadcast %cst_29 : f32 to vector<1x128xf32>
    %61 = arith.mulf %56, %60 : vector<1x128xf32>
    %cst_30 = arith.constant 6.250000e-02 : f32
    %62 = vector.broadcast %cst_30 : f32 to vector<1x128xf32>
    %63 = arith.mulf %59, %62 : vector<1x128xf32>
    %64 = arith.mulf %61, %61 : vector<1x128xf32>
    %65 = arith.subf %63, %64 : vector<1x128xf32>
    %cst_31 = arith.constant 0.000000e+00 : f32
    %66 = vector.broadcast %cst_31 : f32 to vector<1x128xf32>
    %67 = arith.maximumf %65, %66 : vector<1x128xf32>
    %68 = vector.broadcast %61 : vector<1x128xf32> to vector<256x128xf32>
    %69 = arith.subf %54, %68 : vector<256x128xf32>
    %cst_32 = arith.constant 9.99999974E-6 : f32
    %70 = vector.broadcast %cst_32 : f32 to vector<1x128xf32>
    %71 = arith.addf %67, %70 : vector<1x128xf32>
    %72 = math.rsqrt %71 : vector<1x128xf32>
    %73 = vector.broadcast %72 : vector<1x128xf32> to vector<256x128xf32>
    %74 = arith.mulf %69, %73 : vector<256x128xf32>
    %c0_33 = arith.constant 0 : index
    %c0_34 = arith.constant 0 : index
    %75 = vector.load %arg9[%c0_33, %c0_34] : memref<1x128xf32, #tpu.memory_space<vmem>>, vector<1x128xf32>
    %76 = vector.broadcast %75 : vector<1x128xf32> to vector<256x128xf32>
    %77 = arith.mulf %74, %76 : vector<256x128xf32>
    %c0_35 = arith.constant 0 : index
    %c0_36 = arith.constant 0 : index
    %78 = vector.load %arg10[%c0_35, %c0_36] : memref<1x128xf32, #tpu.memory_space<vmem>>, vector<1x128xf32>
    %79 = vector.broadcast %78 : vector<1x128xf32> to vector<256x128xf32>
    %80 = arith.addf %77, %79 : vector<256x128xf32>
    %cst_37 = arith.constant 0.000000e+00 : f32
    %81 = vector.broadcast %cst_37 : f32 to vector<256x128xf32>
    %82 = arith.cmpf ogt, %80, %81 : vector<256x128xf32>
    %cst_38 = arith.constant 1.000000e-01 : f32
    %83 = vector.broadcast %cst_38 : f32 to vector<256x128xf32>
    %84 = arith.mulf %83, %80 : vector<256x128xf32>
    %85 = arith.select %82, %80, %84 : vector<256x128xi1>, vector<256x128xf32>
    %cst_39 = arith.constant 0.000000e+00 : f32
    %86 = vector.shape_cast %3 : vector<256x1xi1> to vector<256x1xi1>
    %87 = vector.broadcast %86 : vector<256x1xi1> to vector<256x128xi1>
    %88 = vector.broadcast %cst_39 : f32 to vector<256x128xf32>
    %89 = arith.select %87, %85, %88 : vector<256x128xi1>, vector<256x128xf32>
    %90 = arith.truncf %89 : vector<256x128xf32> to vector<256x128xbf16>
    %c0_40 = arith.constant 0 : index
    %c0_41 = arith.constant 0 : index
    %91 = vector.load %arg11[%c0_40, %c0_41] : memref<128x128xbf16, #tpu.memory_space<vmem>>, vector<128x128xbf16>
    %c0_42 = arith.constant 0 : index
    %c0_43 = arith.constant 0 : index
    %92 = vector.load %arg12[%c0_42, %c0_43] : memref<1x128xf32, #tpu.memory_space<vmem>>, vector<1x128xf32>
    %cst_44 = arith.constant dense<0.000000e+00> : vector<256x128xf32>
    %93 = tpu.matmul %90, %91, %cst_44 {dimension_numbers = #tpu.dot_dimension_numbers<[1], [0], [0], [1], [0, 0, 1, 1], [], []>} : vector<256x128xbf16>, vector<128x128xbf16>, vector<256x128xf32> -> vector<256x128xf32>
    %94 = vector.broadcast %92 : vector<1x128xf32> to vector<256x128xf32>
    %95 = arith.addf %93, %94 : vector<256x128xf32>
    %96 = arith.truncf %95 : vector<256x128xf32> to vector<256x128xbf16>
    %cst_45 = arith.constant dense<0.000000e+00> : vector<256x128xf32>
    %97 = tpu.matmul %0, %96, %cst_45 {dimension_numbers = #tpu.dot_dimension_numbers<[1], [0], [0], [1], [0, 0, 1, 1], [], []>} : vector<256x256xbf16>, vector<256x128xbf16>, vector<256x128xf32> -> vector<256x128xf32>
    %cst_46 = arith.constant dense<0.000000e+00> : vector<128xf32>
    %98 = vector.multi_reduction <add>, %97, %cst_46 [0] : vector<256x128xf32> to vector<128xf32>
    %99 = vector.shape_cast %98 : vector<128xf32> to vector<1x128xf32>
    %100 = arith.mulf %97, %97 : vector<256x128xf32>
    %cst_47 = arith.constant dense<0.000000e+00> : vector<128xf32>
    %101 = vector.multi_reduction <add>, %100, %cst_47 [0] : vector<256x128xf32> to vector<128xf32>
    %102 = vector.shape_cast %101 : vector<128xf32> to vector<1x128xf32>
    %cst_48 = arith.constant 6.250000e-02 : f32
    %103 = vector.broadcast %cst_48 : f32 to vector<1x128xf32>
    %104 = arith.mulf %99, %103 : vector<1x128xf32>
    %cst_49 = arith.constant 6.250000e-02 : f32
    %105 = vector.broadcast %cst_49 : f32 to vector<1x128xf32>
    %106 = arith.mulf %102, %105 : vector<1x128xf32>
    %107 = arith.mulf %104, %104 : vector<1x128xf32>
    %108 = arith.subf %106, %107 : vector<1x128xf32>
    %cst_50 = arith.constant 0.000000e+00 : f32
    %109 = vector.broadcast %cst_50 : f32 to vector<1x128xf32>
    %110 = arith.maximumf %108, %109 : vector<1x128xf32>
    %111 = vector.broadcast %104 : vector<1x128xf32> to vector<256x128xf32>
    %112 = arith.subf %97, %111 : vector<256x128xf32>
    %cst_51 = arith.constant 9.99999974E-6 : f32
    %113 = vector.broadcast %cst_51 : f32 to vector<1x128xf32>
    %114 = arith.addf %110, %113 : vector<1x128xf32>
    %115 = math.rsqrt %114 : vector<1x128xf32>
    %116 = vector.broadcast %115 : vector<1x128xf32> to vector<256x128xf32>
    %117 = arith.mulf %112, %116 : vector<256x128xf32>
    %c0_52 = arith.constant 0 : index
    %c0_53 = arith.constant 0 : index
    %118 = vector.load %arg13[%c0_52, %c0_53] : memref<1x128xf32, #tpu.memory_space<vmem>>, vector<1x128xf32>
    %119 = vector.broadcast %118 : vector<1x128xf32> to vector<256x128xf32>
    %120 = arith.mulf %117, %119 : vector<256x128xf32>
    %c0_54 = arith.constant 0 : index
    %c0_55 = arith.constant 0 : index
    %121 = vector.load %arg14[%c0_54, %c0_55] : memref<1x128xf32, #tpu.memory_space<vmem>>, vector<1x128xf32>
    %122 = vector.broadcast %121 : vector<1x128xf32> to vector<256x128xf32>
    %123 = arith.addf %120, %122 : vector<256x128xf32>
    %cst_56 = arith.constant 0.000000e+00 : f32
    %124 = vector.broadcast %cst_56 : f32 to vector<256x128xf32>
    %125 = arith.cmpf ogt, %123, %124 : vector<256x128xf32>
    %cst_57 = arith.constant 1.000000e-01 : f32
    %126 = vector.broadcast %cst_57 : f32 to vector<256x128xf32>
    %127 = arith.mulf %126, %123 : vector<256x128xf32>
    %128 = arith.select %125, %123, %127 : vector<256x128xi1>, vector<256x128xf32>
    %cst_58 = arith.constant 0.000000e+00 : f32
    %129 = vector.shape_cast %3 : vector<256x1xi1> to vector<256x1xi1>
    %130 = vector.broadcast %129 : vector<256x1xi1> to vector<256x128xi1>
    %131 = vector.broadcast %cst_58 : f32 to vector<256x128xf32>
    %132 = arith.select %130, %128, %131 : vector<256x128xi1>, vector<256x128xf32>
    %133 = arith.truncf %132 : vector<256x128xf32> to vector<256x128xbf16>
    %c0_59 = arith.constant 0 : index
    %134 = memref.load %arg17[%c0_59] : memref<1xf32, #tpu.memory_space<smem>>
    %135 = arith.extf %133 : vector<256x128xbf16> to vector<256x128xf32>
    %cst_60 = arith.constant 0.000000e+00 : f32
    %cst_61 = arith.constant 1.000000e+02 : f32
    %136 = vector.broadcast %cst_60 : f32 to vector<256x128xf32>
    %137 = arith.maximumf %136, %135 : vector<256x128xf32>
    %138 = vector.broadcast %cst_61 : f32 to vector<256x128xf32>
    %139 = arith.minimumf %138, %137 : vector<256x128xf32>
    %cst_62 = arith.constant 0.000000e+00 : f32
    %140 = vector.broadcast %cst_62 : f32 to vector<256x128xf32>
    %141 = arith.cmpf ogt, %139, %140 : vector<256x128xf32>
    %cst_63 = arith.constant 1.000000e+00 : f32
    %142 = vector.broadcast %cst_63 : f32 to vector<256x128xf32>
    %143 = arith.select %141, %139, %142 : vector<256x128xi1>, vector<256x128xf32>
    %cst_64 = arith.constant 0.000000e+00 : f32
    %144 = vector.broadcast %cst_64 : f32 to vector<256x128xf32>
    %145 = arith.cmpf ogt, %139, %144 : vector<256x128xf32>
    %146 = math.log %143 : vector<256x128xf32>
    %147 = vector.broadcast %134 : f32 to vector<256x128xf32>
    %148 = arith.mulf %147, %146 : vector<256x128xf32>
    %149 = math.exp %148 : vector<256x128xf32>
    %cst_65 = arith.constant 0.000000e+00 : f32
    %150 = vector.broadcast %cst_65 : f32 to vector<256x128xf32>
    %151 = arith.select %145, %149, %150 : vector<256x128xi1>, vector<256x128xf32>
    %cst_66 = arith.constant dense<0.000000e+00> : vector<128xf32>
    %152 = vector.multi_reduction <add>, %151, %cst_66 [0] : vector<256x128xf32> to vector<128xf32>
    %153 = vector.shape_cast %152 : vector<128xf32> to vector<1x128xf32>
    %cst_67 = arith.constant 6.250000e-02 : f32
    %154 = vector.broadcast %cst_67 : f32 to vector<1x128xf32>
    %155 = arith.mulf %153, %154 : vector<1x128xf32>
    %cst_68 = arith.constant 0.000000e+00 : f32
    %cst_69 = arith.constant 1.000000e+02 : f32
    %156 = vector.broadcast %cst_68 : f32 to vector<1x128xf32>
    %157 = arith.maximumf %156, %155 : vector<1x128xf32>
    %158 = vector.broadcast %cst_69 : f32 to vector<1x128xf32>
    %159 = arith.minimumf %158, %157 : vector<1x128xf32>
    %cst_70 = arith.constant 1.000000e+00 : f32
    %160 = arith.divf %cst_70, %134 : f32
    %cst_71 = arith.constant 0.000000e+00 : f32
    %161 = vector.broadcast %cst_71 : f32 to vector<1x128xf32>
    %162 = arith.cmpf ogt, %159, %161 : vector<1x128xf32>
    %cst_72 = arith.constant 1.000000e+00 : f32
    %163 = vector.broadcast %cst_72 : f32 to vector<1x128xf32>
    %164 = arith.select %162, %159, %163 : vector<1x128xi1>, vector<1x128xf32>
    %cst_73 = arith.constant 0.000000e+00 : f32
    %165 = vector.broadcast %cst_73 : f32 to vector<1x128xf32>
    %166 = arith.cmpf ogt, %159, %165 : vector<1x128xf32>
    %167 = math.log %164 : vector<1x128xf32>
    %168 = vector.broadcast %160 : f32 to vector<1x128xf32>
    %169 = arith.mulf %168, %167 : vector<1x128xf32>
    %170 = math.exp %169 : vector<1x128xf32>
    %cst_74 = arith.constant 0.000000e+00 : f32
    %171 = vector.broadcast %cst_74 : f32 to vector<1x128xf32>
    %172 = arith.select %166, %170, %171 : vector<1x128xi1>, vector<1x128xf32>
    %c0_75 = arith.constant 0 : index
    %c0_76 = arith.constant 0 : index
    %173 = vector.load %arg15[%c0_75, %c0_76] : memref<128x128xf32, #tpu.memory_space<vmem>>, vector<128x128xf32>
    %cst_77 = arith.constant dense<0.000000e+00> : vector<1x128xf32>
    %174 = tpu.matmul %172, %173, %cst_77 {dimension_numbers = #tpu.dot_dimension_numbers<[1], [0], [0], [1], [0, 0, 1, 1], [], []>} : vector<1x128xf32>, vector<128x128xf32>, vector<1x128xf32> -> vector<1x128xf32>
    %c0_78 = arith.constant 0 : index
    %c0_79 = arith.constant 0 : index
    %175 = vector.load %arg16[%c0_78, %c0_79] : memref<1x128xf32, #tpu.memory_space<vmem>>, vector<1x128xf32>
    %176 = arith.addf %174, %175 : vector<1x128xf32>
    %c0_80 = arith.constant 0 : index
    %c0_81 = arith.constant 0 : index
    %177 = vector.load %arg18[%c0_80, %c0_81] : memref<1x128xf32, #tpu.memory_space<vmem>>, vector<1x128xf32>
    tpu.vector_store %arg18[%c0_80, %c0_81], %176 {strides = array<i32>} : memref<1x128xf32, #tpu.memory_space<vmem>>, vector<1x128xf32>,
    return
  }
}

</mosaic_0001>

<bundles_post_ra>
// kernel: mul.1
= control target key start
LH: loop header
LB: loop body
LE: loop exit
PB: predicated region body
PF: predicated region fallthrough
CT: control target
= control target key end

     0   :  { %s34_s0 = inlined_call_operand.vmem [shape: f32[48], index: 0, kind: input, shape index: {}]   ;;  %s35_s1 = inlined_call_operand.vmem [shape: f32[48], index: 1, kind: input, shape index: {}]   ;;  %s36_s2 = inlined_call_operand.vmem [shape: f32[48], index: 2, kind: output, shape index: {}]  }
   0x1   :  { %v3_v0 = vld [vmem:[%s34_s0] sm:$0x1] }
   0x2   :  { %v4_v1 = vld [vmem:[%s35_s1] sm:$0x1] }
   0x3   :  { %v7_v2 = vmul.f32 %v4_v1, %v3_v0 }
   0x5   :  { %9 = vst [vmem:[%s36_s2] sm:$0x1] %v7_v2 }

// kernel: gcn_decoder_forward.1
= control target key start
LH: loop header
LB: loop body
LE: loop exit
PB: predicated region body
PF: predicated region fallthrough
CT: control target
= control target key end

     0   :  { %s5212_s0 = inlined_call_operand.vmem [shape: bf16[256,256], index: 0, kind: input, shape index: {}]   ;;  %s5213_s1 = inlined_call_operand.vmem [shape: bf16[256,128], index: 1, kind: input, shape index: {}]   ;;  %s5214_s2 = inlined_call_operand.vmem [shape: f32[256,1], index: 2, kind: input, shape index: {}]   ;;  %s5215_s3 = inlined_call_operand.vmem [shape: bf16[128,128], index: 3, kind: input, shape index: {}]   ;;  %s5216_s4 = inlined_call_operand.vmem [shape: f32[1,128], index: 4, kind: input, shape index: {}]   ;;  %s5217_s5 = inlined_call_operand.vmem [shape: f32[1,128], index: 5, kind: input, shape index: {}]   ;;  %s5218_s6 = inlined_call_operand.vmem [shape: f32[1,128], index: 6, kind: input, shape index: {}]   ;;  %s5219_s7 = inlined_call_operand.vmem [shape: bf16[128,128], index: 7, kind: input, shape index: {}]   ;;  %s5220_s8 = inlined_call_operand.vmem [shape: f32[1,128], index: 8, kind: input, shape index: {}]   ;;  %s5221_s9 = inlined_call_operand.vmem [shape: f32[1,128], index: 9, kind: input, shape index: {}]   ;;  %s5222_s10 = inlined_call_operand.vmem [shape: f32[1,128], index: 10, kind: input, shape index: {}]   ;;  %s5223_s11 = inlined_call_operand.vmem [shape: bf16[128,128], index: 11, kind: input, shape index: {}]   ;;  %s5224_s12 = inlined_call_operand.vmem [shape: f32[1,128], index: 12, kind: input, shape index: {}]   ;;  %s5225_s13 = inlined_call_operand.vmem [shape: f32[1,128], index: 13, kind: input, shape index: {}]   ;;  %s5226_s14 = inlined_call_operand.vmem [shape: f32[1,128], index: 14, kind: input, shape index: {}]   ;;  %s5227_s15 = inlined_call_operand.vmem [shape: f32[128,128], index: 15, kind: input, shape index: {}]   ;;  %s5228_s16 = inlined_call_operand.vmem [shape: f32[1,128], index: 16, kind: input, shape index: {}]   ;;  %s5229_s17 = inlined_call_operand.<no memory space> [shape: f32[1], index: 17, kind: input, shape index: {}]   ;;  %s5230_s18 = inlined_call_operand.vmem [shape: f32[1,128], index: 18, kind: output, shape index: {}]  }
   0x1   :  { %5233 = sst [smem:[#allocation7_spill]] %s5212_s0 }
   0x2   :  { %5234 = sst [smem:[#allocation8_spill]] %s5213_s1  ;;  %s5235_s29 = sld [smem:[#allocation7_spill]] }
   0x8   :  { %v76_v0 = vld [vmem:[%s5235_s29] sm:$0xf]  ;;  %v78_v1 = vld [vmem:[%s5235_s29 + $0x8] sm:$0xf]  ;;  %v80_v2 = vld [vmem:[%s5235_s29 + $0x4] sm:$0xf] }
   0x9   :  { %77 = vst [vmem:[#allocation2] sm:$0xf] %v76_v0  ;;  %79 = vst [vmem:[#allocation2 + $0x4] sm:$0xf] %v78_v1  ;;  %v82_v3 = vld [vmem:[%s5235_s29 + $0xc] sm:$0xff]   ;;  %v90_v6 = vld [vmem:[%s5235_s29 + $0x1c] sm:$0xff]  }
   0xa   :  { %81 = vst [vmem:[#allocation2 + $0x8] sm:$0xf] %v80_v2  ;;  %v86_v4 = vld [vmem:[%s5235_s29 + $0x18] sm:$0xf]  ;;  %v88_v5 = vld [vmem:[%s5235_s29 + $0x14] sm:$0xf] }
   0xb   :  { %83 = vst [vmem:[#allocation2 + $0xc] sm:$0xff] %v82_v3   ;;  %87 = vst [vmem:[#allocation2 + $0x14] sm:$0xf] %v86_v4  ;;  %v94_v7 = vld [vmem:[%s5235_s29 + $0x28] sm:$0xf]  ;;  %v98_v9 = vld [vmem:[%s5235_s29 + $0x2c] sm:$0xff]  }
   0xc   :  { %89 = vst [vmem:[#allocation2 + $0x18] sm:$0xf] %v88_v5  ;;  %v96_v8 = vld [vmem:[%s5235_s29 + $0x24] sm:$0xf]  ;;  %91 = vst [vmem:[#allocation2 + $0x1c] sm:$0xff] %v90_v6   ;;  %v106_v12 = vld [vmem:[%s5235_s29 + $0x3c] sm:$0xff]  }
   0xd   :  { %95 = vst [vmem:[#allocation2 + $0x24] sm:$0xf] %v94_v7  ;;  %97 = vst [vmem:[#allocation2 + $0x28] sm:$0xf] %v96_v8  ;;  %v102_v10 = vld [vmem:[%s5235_s29 + $0x38] sm:$0xf] }
   0xe   :  { %v104_v11 = vld [vmem:[%s5235_s29 + $0x34] sm:$0xf]  ;;  %99 = vst [vmem:[#allocation2 + $0x2c] sm:$0xff] %v98_v9   ;;  %103 = vst [vmem:[#allocation2 + $0x34] sm:$0xf] %v102_v10  ;;  %v114_v15 = vld [vmem:[%s5235_s29 + $0x4c] sm:$0xff]  }
   0xf   :  { %105 = vst [vmem:[#allocation2 + $0x38] sm:$0xf] %v104_v11  ;;  %v110_v13 = vld [vmem:[%s5235_s29 + $0x48] sm:$0xf]  ;;  %v112_v14 = vld [vmem:[%s5235_s29 + $0x44] sm:$0xf] }
  0x10   :  { %107 = vst [vmem:[#allocation2 + $0x3c] sm:$0xff] %v106_v12   ;;  %111 = vst [vmem:[#allocation2 + $0x44] sm:$0xf] %v110_v13  ;;  %v118_v16 = vld [vmem:[%s5235_s29 + $0x58] sm:$0xf]  ;;  %v122_v18 = vld [vmem:[%s5235_s29 + $0x5c] sm:$0xff]  }
  0x11   :  { %113 = vst [vmem:[#allocation2 + $0x48] sm:$0xf] %v112_v14  ;;  %v120_v17 = vld [vmem:[%s5235_s29 + $0x54] sm:$0xf]  ;;  %115 = vst [vmem:[#allocation2 + $0x4c] sm:$0xff] %v114_v15   ;;  %v130_v21 = vld [vmem:[%s5235_s29 + $0x6c] sm:$0xff]  }
  0x12   :  { %119 = vst [vmem:[#allocation2 + $0x54] sm:$0xf] %v118_v16  ;;  %121 = vst [vmem:[#allocation2 + $0x58] sm:$0xf] %v120_v17  ;;  %v126_v19 = vld [vmem:[%s5235_s29 + $0x68] sm:$0xf] }
  0x13   :  { %v128_v20 = vld [vmem:[%s5235_s29 + $0x64] sm:$0xf]  ;;  %123 = vst [vmem:[#allocation2 + $0x5c] sm:$0xff] %v122_v18   ;;  %127 = vst [vmem:[#allocation2 + $0x64] sm:$0xf] %v126_v19  ;;  %v138_v24 = vld [vmem:[%s5235_s29 + $0x7c] sm:$0xff]  }
  0x14   :  { %129 = vst [vmem:[#allocation2 + $0x68] sm:$0xf] %v128_v20  ;;  %v134_v22 = vld [vmem:[%s5235_s29 + $0x78] sm:$0xf]  ;;  %v136_v23 = vld [vmem:[%s5235_s29 + $0x74] sm:$0xf] }
  0x15   :  { %131 = vst [vmem:[#allocation2 + $0x6c] sm:$0xff] %v130_v21   ;;  %135 = vst [vmem:[#allocation2 + $0x74] sm:$0xf] %v134_v22  ;;  %v142_v25 = vld [vmem:[%s5235_s29 + $0x88] sm:$0xf]  ;;  %v146_v27 = vld [vmem:[%s5235_s29 + $0x8c] sm:$0xff]  }
  0x16   :  { %137 = vst [vmem:[#allocation2 + $0x78] sm:$0xf] %v136_v23  ;;  %v144_v26 = vld [vmem:[%s5235_s29 + $0x84] sm:$0xf]  ;;  %139 = vst [vmem:[#allocation2 + $0x7c] sm:$0xff] %v138_v24   ;;  %v154_v30 = vld [vmem:[%s5235_s29 + $0x9c] sm:$0xff]  }
  0x17   :  { %143 = vst [vmem:[#allocation2 + $0x84] sm:$0xf] %v142_v25  ;;  %145 = vst [vmem:[#allocation2 + $0x88] sm:$0xf] %v144_v26  ;;  %v150_v28 = vld [vmem:[%s5235_s29 + $0x98] sm:$0xf] }
  0x18   :  { %v152_v29 = vld [vmem:[%s5235_s29 + $0x94] sm:$0xf]  ;;  %147 = vst [vmem:[#allocation2 + $0x8c] sm:$0xff] %v146_v27   ;;  %151 = vst [vmem:[#allocation2 + $0x94] sm:$0xf] %v150_v28  ;;  %v162_v33 = vld [vmem:[%s5235_s29 + $0xac] sm:$0xff]  }
  0x19   :  { %153 = vst [vmem:[#allocation2 + $0x98] sm:$0xf] %v152_v29  ;;  %v158_v31 = vld [vmem:[%s5235_s29 + $0xa8] sm:$0xf]  ;;  %v160_v32 = vld [vmem:[%s5235_s29 + $0xa4] sm:$0xf] }
  0x1a   :  { %155 = vst [vmem:[#allocation2 + $0x9c] sm:$0xff] %v154_v30   ;;  %159 = vst [vmem:[#allocation2 + $0xa4] sm:$0xf] %v158_v31  ;;  %v166_v34 = vld [vmem:[%s5235_s29 + $0xb8] sm:$0xf]  ;;  %v170_v36 = vld [vmem:[%s5235_s29 + $0xbc] sm:$0xff]  }
  0x1b   :  { %161 = vst [vmem:[#allocation2 + $0xa8] sm:$0xf] %v160_v32  ;;  %v168_v35 = vld [vmem:[%s5235_s29 + $0xb4] sm:$0xf]  ;;  %163 = vst [vmem:[#allocation2 + $0xac] sm:$0xff] %v162_v33   ;;  %v178_v39 = vld [vmem:[%s5235_s29 + $0xcc] sm:$0xff]  }
  0x1c   :  { %167 = vst [vmem:[#allocation2 + $0xb4] sm:$0xf] %v166_v34  ;;  %169 = vst [vmem:[#allocation2 + $0xb8] sm:$0xf] %v168_v35  ;;  %v174_v37 = vld [vmem:[%s5235_s29 + $0xc8] sm:$0xf] }
  0x1d   :  { %v176_v38 = vld [vmem:[%s5235_s29 + $0xc4] sm:$0xf]  ;;  %171 = vst [vmem:[#allocation2 + $0xbc] sm:$0xff] %v170_v36   ;;  %175 = vst [vmem:[#allocation2 + $0xc4] sm:$0xf] %v174_v37  ;;  %v186_v42 = vld [vmem:[%s5235_s29 + $0xdc] sm:$0xff]  }
  0x1e   :  { %177 = vst [vmem:[#allocation2 + $0xc8] sm:$0xf] %v176_v38  ;;  %v182_v40 = vld [vmem:[%s5235_s29 + $0xd8] sm:$0xf]  ;;  %v184_v41 = vld [vmem:[%s5235_s29 + $0xd4] sm:$0xf] }
  0x1f   :  { %179 = vst [vmem:[#allocation2 + $0xcc] sm:$0xff] %v178_v39   ;;  %183 = vst [vmem:[#allocation2 + $0xd4] sm:$0xf] %v182_v40  ;;  %v190_v43 = vld [vmem:[%s5235_s29 + $0xe8] sm:$0xf]  ;;  %v194_v45 = vld [vmem:[%s5235_s29 + $0xec] sm:$0xff]  }
  0x20   :  { %185 = vst [vmem:[#allocation2 + $0xd8] sm:$0xf] %v184_v41  ;;  %v192_v44 = vld [vmem:[%s5235_s29 + $0xe4] sm:$0xf]  ;;  %187 = vst [vmem:[#allocation2 + $0xdc] sm:$0xff] %v186_v42  }
  0x21   :  { %191 = vst [vmem:[#allocation2 + $0xe4] sm:$0xf] %v190_v43  ;;  %193 = vst [vmem:[#allocation2 + $0xe8] sm:$0xf] %v192_v44  ;;  %v198_v46 = vld [vmem:[%s5235_s29 + $0xf8] sm:$0xf] }
  0x22   :  { %v200_v47 = vld [vmem:[%s5235_s29 + $0xf4] sm:$0xf]  ;;  %195 = vst [vmem:[#allocation2 + $0xec] sm:$0xff] %v194_v45   ;;  %199 = vst [vmem:[#allocation2 + $0xf4] sm:$0xf] %v198_v46 }
  0x23   :  { %201 = vst [vmem:[#allocation2 + $0xf8] sm:$0xf] %v200_v47  ;;  %v202_v48 = vld [vmem:[%s5235_s29 + $0xfc] sm:$0xf] }
  0x24   :  { %203 = vst [vmem:[#allocation2 + $0xfc] sm:$0xf] %v202_v48 }
  0x25   :  { %362 = vsyncadd [#allocation3], 4096 }
  0x26   :  { %4398 = dma.done.wait [#allocation3], 4096 }
  0x27   :  { %4399 = vsyncadd [#allocation3], 4294963200  ;;  %v4298_v49 = vld [vmem:[%s5215_s3] sm:$0xff]   ;;  %v4299_v50 = vld [vmem:[%s5215_s3 + $0x8] sm:$0xff]   ;;  %s5236_s2 = sld [smem:[#allocation8_spill]]  ;;  %vm4401_vm10 = vmmov 0  }
  0x28   :  { %4074 = vmatprep.subr.bf16.mxu0 %v4298_v49  ;;  %v4300_v51 = vld [vmem:[%s5215_s3 + $0x10] sm:$0xff]   ;;  %v4301_v52 = vld [vmem:[%s5215_s3 + $0x18] sm:$0xff]   ;;  %v4302_v54 = vld [vmem:[%s5215_s3 + $0x20] sm:$0xff]  }
  0x29   :  { %4075 = vmatpush3.bf16.msra.mxu0 %v4298_v49  ;;  %v4303_v55 = vld [vmem:[%s5215_s3 + $0x28] sm:$0xff]   ;;  %v4304_v56 = vld [vmem:[%s5215_s3 + $0x30] sm:$0xff]   ;;  %v4305_v57 = vld [vmem:[%s5215_s3 + $0x38] sm:$0xff]  }
  0x2a   :  { %4076 = vmatprep.subr.bf16.mxu0 %v4299_v50  ;;  %v4717_v9 = vld [vmem:[#allocation2 + $0x8] sm:$0xff]  ;;  %v4723_v11 = vld [vmem:[%s5216_s4] ss:$0 sm:$0xff] }
  0x2b   :  { %872 = vmatprep.mubr.bf16.mxu1 %v4717_v9 }
  0x2d   :  { %4077 = vmatpush3.bf16.msra.mxu0 %v4299_v50  ;;  %v4306_v53 = vld [vmem:[%s5236_s2] sm:$0xff]   ;;  %v4307_v58 = vld [vmem:[%s5236_s2 + $0x8] sm:$0xff]   ;;  %v4308_v59 = vld [vmem:[%s5236_s2 + $0x10] sm:$0xff]  }
  0x2e   :  { %4078 = vmatprep.subr.bf16.mxu0 %v4300_v51  ;;  %4090 = vmatprep.mubr.bf16.mxu0 %v4306_v53  ;;  %v4309_v60 = vld [vmem:[%s5236_s2 + $0x18] sm:$0xff]   ;;  %v4310_v61 = vld [vmem:[%s5236_s2 + $0x20] sm:$0xff]   ;;  %v4311_v62 = vld [vmem:[%s5236_s2 + $0x28] sm:$0xff]  }
  0x2f   :  { %v4312_v63 = vld [vmem:[%s5236_s2 + $0x30] sm:$0xff]   ;;  %v4313_v0 = vld [vmem:[%s5236_s2 + $0x38] sm:$0xff]   ;;  %v4314_v1 = vld [vmem:[%s5236_s2 + $0x40] sm:$0xff]  }
  0x30   :  { %v4315_v2 = vld [vmem:[%s5236_s2 + $0x48] sm:$0xff]   ;;  %v4316_v3 = vld [vmem:[%s5236_s2 + $0x50] sm:$0xff]   ;;  %v4317_v4 = vld [vmem:[%s5236_s2 + $0x58] sm:$0xff]  }
  0x31   :  { %4079 = vmatpush3.bf16.msra.mxu0 %v4300_v51  ;;  %v4318_v5 = vld [vmem:[%s5236_s2 + $0x60] sm:$0xff]   ;;  %v4319_v6 = vld [vmem:[%s5236_s2 + $0x68] sm:$0xff]   ;;  %v4320_v7 = vld [vmem:[%s5236_s2 + $0x70] sm:$0xff]  }
  0x32   :  { %4080 = vmatprep.subr.bf16.mxu0 %v4301_v52  ;;  %v4321_v8 = vld [vmem:[%s5236_s2 + $0x78] sm:$0xff]  }
  0x35   :  { %4081 = vmatpush3.bf16.msra.mxu0 %v4301_v52 }
  0x36   :  { %4082 = vmatprep.subr.bf16.mxu0 %v4302_v54 }
  0x39   :  { %4083 = vmatpush3.bf16.msra.mxu0 %v4302_v54 }
  0x3a   :  { %4084 = vmatprep.subr.bf16.mxu0 %v4303_v55 }
  0x3d   :  { %4085 = vmatpush3.bf16.msra.mxu0 %v4303_v55 }
  0x3e   :  { %4086 = vmatprep.subr.bf16.mxu0 %v4304_v56 }
  0x41   :  { %4087 = vmatpush3.bf16.msra.mxu0 %v4304_v56 }
  0x42   :  { %4088 = vmatprep.subr.bf16.mxu0 %v4305_v57 }
  0x45   :  { %4089 = vmatpush3.bf16.msra.mxu0 %v4305_v57 }
  0x48   :  { %4091 = vmatmul.mubr.bf16.vlgmr.msra.gmra.mrb[0].mxu0 %v4307_v58 }
  0x49   :  { %4094 = vmatprep.mubr.bf16.mxu0 %v4308_v59 }
  0x50   :  { %4095 = vmatmul.mubr.bf16.gmra.mrb[4].mxu0 %v4309_v60 }
  0x51   :  { %4098 = vmatprep.mubr.bf16.mxu0 %v4310_v61 }
  0x58   :  { %4099 = vmatmul.mubr.bf16.gmra.mrb[8].mxu0 %v4311_v62 }
  0x59   :  { %4102 = vmatprep.mubr.bf16.mxu0 %v4312_v63 }
  0x60   :  { %4103 = vmatmul.mubr.bf16.gmra.mrb[12].mxu0 %v4313_v0 }
  0x61   :  { %4106 = vmatprep.mubr.bf16.mxu0 %v4314_v1 }
  0x68   :  { %4107 = vmatmul.mubr.bf16.gmra.mrb[16].mxu0 %v4315_v2 }
  0x69   :  { %4110 = vmatprep.mubr.bf16.mxu0 %v4316_v3 }
  0x70   :  { %4111 = vmatmul.mubr.bf16.gmra.mrb[20].mxu0 %v4317_v4 }
  0x71   :  { %4114 = vmatprep.mubr.bf16.mxu0 %v4318_v5 }
  0x78   :  { %4115 = vmatmul.mubr.bf16.gmra.mrb[24].mxu0 %v4319_v6 }
  0x79   :  { %4118 = vmatprep.mubr.bf16.mxu0 %v4320_v7 }
  0x80   :  { %4119 = vmatmul.mubr.bf16.gmra.mrb[28].mxu0 %v4321_v8 }
 0x11b   :  { %v4092_v10 = vpop.f32.mrb[0].mxu0 }
 0x11c   :  { %v697_v12 = vpop.f32.mrb[1].mxu0  ;;  %v706_v14 = vadd.f32 %v4092_v10, %v4723_v11 }
 0x11d   :  { %v4093_v13 = vpop.f32.mrb[2].mxu0  ;;  %v698_v17 = vadd.f32 %v4723_v11, %v697_v12 }
 0x11e   :  { %v709_v15 = vadd.f32 %v4093_v13, %v4723_v11  ;;  %v700_v16 = vpop.f32.mrb[3].mxu0 }
 0x11f   :  { %v701_v18 = vadd.f32 %v4723_v11, %v700_v16 }
 0x120   :  { %v825_v19 = vpack.c.bf16 %v709_v15, %v706_v14 }
 0x121   :  { %v824_v20 = vpack.c.bf16 %v701_v18, %v698_v17 }
 0x123   :  { %v4096_v21 = vpop.f32.mrb[4].mxu0 }
 0x124   :  { %v713_v22 = vpop.f32.mrb[5].mxu0  ;;  %v4730_v24 = vadd.f32 %v4096_v21, %v4723_v11 }
 0x125   :  { %v4097_v23 = vpop.f32.mrb[6].mxu0  ;;  %v714_v27 = vadd.f32 %v4723_v11, %v713_v22 }
 0x126   :  { %v725_v25 = vadd.f32 %v4097_v23, %v4723_v11  ;;  %v716_v26 = vpop.f32.mrb[7].mxu0 }
 0x127   :  { %v717_v28 = vadd.f32 %v4723_v11, %v716_v26 }
 0x128   :  { %v827_v29 = vpack.c.bf16 %v725_v25, %v4730_v24 }
 0x129   :  { %v826_v30 = vpack.c.bf16 %v717_v28, %v714_v27 }
 0x12b   :  { %v4100_v31 = vpop.f32.mrb[8].mxu0 }
 0x12c   :  { %v729_v32 = vpop.f32.mrb[9].mxu0  ;;  %v4737_v34 = vadd.f32 %v4100_v31, %v4723_v11  ;;  %v4772_v31 = vld [vmem:[#allocation2 + $0x10] sm:$0xff] }
 0x12d   :  { %v4101_v33 = vpop.f32.mrb[10].mxu0  ;;  %v730_v37 = vadd.f32 %v4723_v11, %v729_v32  ;;  %v4774_v32 = vld [vmem:[#allocation2 + $0x28] sm:$0xff] }
 0x12e   :  { %v4740_v35 = vadd.f32 %v4101_v33, %v4723_v11  ;;  %v732_v36 = vpop.f32.mrb[11].mxu0  ;;  %v4780_v33 = vld [vmem:[#allocation2 + $0x38] sm:$0xff] }
 0x12f   :  { %v733_v38 = vadd.f32 %v4723_v11, %v732_v36  ;;  %v4790_v36 = vld [vmem:[#allocation2 + $0x40] sm:$0xff] }
 0x130   :  { %v829_v39 = vpack.c.bf16 %v4740_v35, %v4737_v34  ;;  %v4784_v34 = vld [vmem:[#allocation2 + $0x30] sm:$0xff]  ;;  %v4786_v35 = vld [vmem:[#allocation2 + $0x48] sm:$0xff] }
 0x131   :  { %v828_v40 = vpack.c.bf16 %v733_v38, %v730_v37  ;;  %v4792_v37 = vld [vmem:[#allocation2 + $0x58] sm:$0xff]  ;;  %v4796_v38 = vld [vmem:[#allocation2 + $0x50] sm:$0xff] }
 0x133   :  { %v4104_v41 = vpop.f32.mrb[12].mxu0 }
 0x134   :  { %v745_v42 = vpop.f32.mrb[13].mxu0  ;;  %v754_v44 = vadd.f32 %v4104_v41, %v4723_v11  ;;  %v4804_v41 = vld [vmem:[#allocation2 + $0x78] sm:$0xff] }
 0x135   :  { %v4105_v43 = vpop.f32.mrb[14].mxu0  ;;  %v746_v47 = vadd.f32 %v4723_v11, %v745_v42  ;;  %v4808_v42 = vld [vmem:[#allocation2 + $0x70] sm:$0xff] }
 0x136   :  { %v757_v45 = vadd.f32 %v4105_v43, %v4723_v11  ;;  %v748_v46 = vpop.f32.mrb[15].mxu0  ;;  %v4810_v43 = vld [vmem:[#allocation2 + $0x88] sm:$0xff] }
 0x137   :  { %v749_v48 = vadd.f32 %v4723_v11, %v748_v46  ;;  %v4820_v46 = vld [vmem:[#allocation2 + $0x90] sm:$0xff] }
 0x138   :  { %v831_v49 = vpack.c.bf16 %v757_v45, %v754_v44  ;;  %v4814_v44 = vld [vmem:[#allocation2 + $0x80] sm:$0xff]  ;;  %v4816_v45 = vld [vmem:[#allocation2 + $0x98] sm:$0xff] }
 0x139   :  { %v830_v50 = vpack.c.bf16 %v749_v48, %v746_v47  ;;  %v4822_v47 = vld [vmem:[#allocation2 + $0xa8] sm:$0xff]  ;;  %v4826_v48 = vld [vmem:[#allocation2 + $0xa0] sm:$0xff] }
 0x13b   :  { %v4108_v51 = vpop.f32.mrb[16].mxu0 }
 0x13c   :  { %v761_v52 = vpop.f32.mrb[17].mxu0  ;;  %v770_v54 = vadd.f32 %v4108_v51, %v4723_v11  ;;  %v4834_v51 = vld [vmem:[#allocation2 + $0xc8] sm:$0xff] }
 0x13d   :  { %v4109_v53 = vpop.f32.mrb[18].mxu0  ;;  %v762_v57 = vadd.f32 %v4723_v11, %v761_v52  ;;  %v4838_v52 = vld [vmem:[#allocation2 + $0xc0] sm:$0xff] }
 0x13e   :  { %v773_v55 = vadd.f32 %v4109_v53, %v4723_v11  ;;  %v764_v56 = vpop.f32.mrb[19].mxu0  ;;  %v4840_v53 = vld [vmem:[#allocation2 + $0xd8] sm:$0xff] }
 0x13f   :  { %v765_v58 = vadd.f32 %v4723_v11, %v764_v56  ;;  %v4850_v56 = vld [vmem:[#allocation2 + $0xe0] sm:$0xff] }
 0x140   :  { %v833_v59 = vpack.c.bf16 %v773_v55, %v770_v54  ;;  %v4844_v54 = vld [vmem:[#allocation2 + $0xd0] sm:$0xff]  ;;  %v4846_v55 = vld [vmem:[#allocation2 + $0xe8] sm:$0xff] }
 0x141   :  { %v832_v60 = vpack.c.bf16 %v765_v58, %v762_v57  ;;  %v4852_v57 = vld [vmem:[#allocation2 + $0xf8] sm:$0xff]  ;;  %v4856_v58 = vld [vmem:[#allocation2 + $0xf0] sm:$0xff] }
 0x143   :  { %v4112_v61 = vpop.f32.mrb[20].mxu0  ;;  %3673 = vmatprep.subr.bf16.mxu1 %v832_v60 }
 0x144   :  { %v777_v62 = vpop.f32.mrb[21].mxu0  ;;  %3674 = vmatpush3.bf16.msra.mxu1 %v824_v20  ;;  %v786_v0 = vadd.f32 %v4112_v61, %v4723_v11 }
 0x145   :  { %v4113_v63 = vpop.f32.mrb[22].mxu0  ;;  %3675 = vmatprep.subr.bf16.mxu1 %v833_v59  ;;  %v778_v3 = vadd.f32 %v4723_v11, %v777_v62 }
 0x146   :  { %v789_v1 = vadd.f32 %v4113_v63, %v4723_v11  ;;  %v780_v2 = vpop.f32.mrb[23].mxu0 }
 0x147   :  { %v781_v4 = vadd.f32 %v4723_v11, %v780_v2 }
 0x148   :  { %v835_v5 = vpack.c.bf16 %v789_v1, %v786_v0  ;;  %3676 = vmatpush3.bf16.msra.mxu1 %v825_v19 }
 0x149   :  { %v834_v6 = vpack.c.bf16 %v781_v4, %v778_v3 }
 0x14b   :  { %v4116_v7 = vpop.f32.mrb[24].mxu0  ;;  %3677 = vmatprep.subr.bf16.mxu1 %v834_v6 }
 0x14c   :  { %v793_v8 = vpop.f32.mrb[25].mxu0  ;;  %3678 = vmatpush3.bf16.msra.mxu1 %v826_v30  ;;  %v802_v12 = vadd.f32 %v4116_v7, %v4723_v11  ;;  %v4768_v30 = vld [vmem:[#allocation2 + $0x18] sm:$0xff] }
 0x14d   :  { %v4117_v10 = vpop.f32.mrb[26].mxu0  ;;  %3679 = vmatprep.subr.bf16.mxu1 %v835_v5  ;;  %v794_v15 = vadd.f32 %v4723_v11, %v793_v8 }
 0x14e   :  { %v805_v13 = vadd.f32 %v4117_v10, %v4723_v11  ;;  %v796_v14 = vpop.f32.mrb[27].mxu0  ;;  %v4322_v10 = vld [vmem:[%s5219_s7] sm:$0xff]  }
 0x14f   :  { %v797_v16 = vadd.f32 %v4723_v11, %v796_v14  ;;  %4122 = vmatprep.subr.bf16.mxu0 %v4322_v10 }
 0x150   :  { %v837_v17 = vpack.c.bf16 %v805_v13, %v802_v12  ;;  %3680 = vmatpush3.bf16.msra.mxu1 %v827_v29  ;;  %v4766_v29 = vld [vmem:[#allocation2] sm:$0xff]  ;;  %4123 = vmatpush3.bf16.msra.mxu0 %v4322_v10  ;;  %v4327_v10 = vld [vmem:[%s5219_s7 + $0x28] sm:$0xff]  }
 0x151   :  { %v836_v18 = vpack.c.bf16 %v797_v16, %v794_v15 }
 0x153   :  { %v4120_v19 = vpop.f32.mrb[28].mxu0  ;;  %3681 = vmatprep.subr.bf16.mxu1 %v836_v18 }
 0x154   :  { %v809_v20 = vpop.f32.mrb[29].mxu0  ;;  %3682 = vmatpush3.bf16.msra.mxu1 %v828_v40  ;;  %v818_v22 = vadd.f32 %v4120_v19, %v4723_v11  ;;  %v4802_v40 = vld [vmem:[#allocation2 + $0x60] sm:$0xff]  ;;  %v4323_v19 = vld [vmem:[%s5219_s7 + $0x8] sm:$0xff]  }
 0x155   :  { %v4121_v21 = vpop.f32.mrb[30].mxu0  ;;  %3683 = vmatprep.subr.bf16.mxu1 %v837_v17  ;;  %v810_v25 = vadd.f32 %v4723_v11, %v809_v20  ;;  %4124 = vmatprep.subr.bf16.mxu0 %v4323_v19 }
 0x156   :  { %v821_v23 = vadd.f32 %v4121_v21, %v4723_v11  ;;  %v812_v24 = vpop.f32.mrb[31].mxu0  ;;  %4125 = vmatpush3.bf16.msra.mxu0 %v4323_v19 }
 0x157   :  { %v813_v26 = vadd.f32 %v4723_v11, %v812_v24  ;;  %v4778_v11 = vld [vmem:[#allocation2 + $0x20] sm:$0xff] }
 0x158   :  { %v839_v27 = vpack.c.bf16 %v821_v23, %v818_v22  ;;  %3684 = vmatpush3.bf16.msra.mxu1 %v829_v39  ;;  %v4798_v39 = vld [vmem:[#allocation2 + $0x68] sm:$0xff] }
 0x159   :  { %v838_v28 = vpack.c.bf16 %v813_v26, %v810_v25  ;;  %v4324_v26 = vld [vmem:[%s5219_s7 + $0x10] sm:$0xff]  }
 0x15a   :  { %4126 = vmatprep.subr.bf16.mxu0 %v4324_v26 }
 0x15b   :  { %3685 = vmatprep.subr.bf16.mxu1 %v838_v28  ;;  %4127 = vmatpush3.bf16.msra.mxu0 %v4324_v26 }
 0x15c   :  { %3686 = vmatpush3.bf16.msra.mxu1 %v830_v50  ;;  %v4832_v50 = vld [vmem:[#allocation2 + $0xb0] sm:$0xff] }
 0x15d   :  { %3687 = vmatprep.subr.bf16.mxu1 %v839_v27 }
 0x160   :  { %3688 = vmatpush3.bf16.msra.mxu1 %v831_v49  ;;  %v4828_v49 = vld [vmem:[#allocation2 + $0xb8] sm:$0xff] }
 0x163   :  { %873 = vmatmul.mubr.bf16.vlgmr.msra.gmra.mrb[0].mxu1 %v4766_v29 }
 0x164   :  { %880 = vmatprep.mubr.bf16.mxu1 %v4768_v30 }
 0x16b   :  { %881 = vmatmul.mubr.bf16.gmra.mrb[4].mxu1 %v4772_v31 }
 0x16c   :  { %888 = vmatprep.mubr.bf16.mxu1 %v4774_v32 }
 0x173   :  { %889 = vmatmul.mubr.bf16.gmra.mrb[8].mxu1 %v4778_v11 }
 0x174   :  { %896 = vmatprep.mubr.bf16.mxu1 %v4780_v33 }
 0x17b   :  { %897 = vmatmul.mubr.bf16.gmra.mrb[12].mxu1 %v4784_v34 }
 0x17c   :  { %904 = vmatprep.mubr.bf16.mxu1 %v4786_v35 }
 0x183   :  { %905 = vmatmul.mubr.bf16.gmra.mrb[16].mxu1 %v4790_v36 }
 0x184   :  { %912 = vmatprep.mubr.bf16.mxu1 %v4792_v37 }
 0x18b   :  { %913 = vmatmul.mubr.bf16.gmra.mrb[20].mxu1 %v4796_v38 }
 0x18c   :  { %920 = vmatprep.mubr.bf16.mxu1 %v4798_v39 }
 0x193   :  { %921 = vmatmul.mubr.bf16.gmra.mrb[24].mxu1 %v4802_v40 }
 0x194   :  { %928 = vmatprep.mubr.bf16.mxu1 %v4804_v41 }
 0x19b   :  { %929 = vmatmul.mubr.bf16.gmra.mrb[28].mxu1 %v4808_v42 }
 0x19c   :  { %936 = vmatprep.mubr.bf16.mxu1 %v4810_v43 }
 0x1a3   :  { %937 = vmatmul.mubr.bf16.gmra.mrb[32].mxu1 %v4814_v44 }
 0x1a4   :  { %944 = vmatprep.mubr.bf16.mxu1 %v4816_v45 }
 0x1ab   :  { %945 = vmatmul.mubr.bf16.gmra.mrb[36].mxu1 %v4820_v46 }
 0x1ac   :  { %952 = vmatprep.mubr.bf16.mxu1 %v4822_v47 }
 0x1b3   :  { %953 = vmatmul.mubr.bf16.gmra.mrb[40].mxu1 %v4826_v48 }
 0x1b4   :  { %960 = vmatprep.mubr.bf16.mxu1 %v4828_v49 }
 0x1bb   :  { %961 = vmatmul.mubr.bf16.gmra.mrb[44].mxu1 %v4832_v50 }
 0x1bc   :  { %968 = vmatprep.mubr.bf16.mxu1 %v4834_v51 }
 0x1c3   :  { %969 = vmatmul.mubr.bf16.gmra.mrb[48].mxu1 %v4838_v52 }
 0x1c4   :  { %976 = vmatprep.mubr.bf16.mxu1 %v4840_v53 }
 0x1cb   :  { %977 = vmatmul.mubr.bf16.gmra.mrb[52].mxu1 %v4844_v54 }
 0x1cc   :  { %984 = vmatprep.mubr.bf16.mxu1 %v4846_v55 }
 0x1d3   :  { %985 = vmatmul.mubr.bf16.gmra.mrb[56].mxu1 %v4850_v56 }
 0x1d4   :  { %992 = vmatprep.mubr.bf16.mxu1 %v4852_v57 }
 0x1db   :  { %993 = vmatmul.mubr.bf16.gmra.mrb[60].mxu1 %v4856_v58 }
 0x236   :  { %v3689_v59 = vpop.f32.mrb[0].mxu1 }
 0x237   :  { %v3690_v60 = vpop.f32.mrb[1].mxu1 }
 0x238   :  { %v4859_v61 = vadd.f32 %v3690_v60, %v3689_v59  ;;  %v3692_v62 = vpop.f32.mrb[2].mxu1 }
 0x239   :  { %v3693_v63 = vpop.f32.mrb[3].mxu1 }
 0x23a   :  { %v4861_v0 = vadd.f32 %v3693_v63, %v3692_v62  ;;  %v1038_v4 = vmul.f32 %v4859_v61, %v4859_v61 }
 0x23c   :  { %v1039_v1 = vmul.f32 %v4861_v0, %v4861_v0  ;;  %v1001_v5 = vadd.f32 %v4861_v0, %v4859_v61 }
 0x23e   :  { %v3695_v2 = vpop.f32.mrb[4].mxu1  ;;  %v1070_v12 = vadd.f32 %v1039_v1, %v1038_v4  ;;  %v4325_v1 = vld [vmem:[%s5219_s7 + $0x18] sm:$0xff]  }
 0x23f   :  { %v3696_v3 = vpop.f32.mrb[5].mxu1  ;;  %4128 = vmatprep.subr.bf16.mxu0 %v4325_v1 }
 0x240   :  { %v3697_v6 = vadd.f32 %v3696_v3, %v3695_v2  ;;  %v3698_v7 = vpop.f32.mrb[6].mxu1  ;;  %v4326_v2 = vld [vmem:[%s5219_s7 + $0x20] sm:$0xff]   ;;  %4129 = vmatpush3.bf16.msra.mxu0 %v4325_v1 }
 0x241   :  { %v3699_v8 = vpop.f32.mrb[7].mxu1  ;;  %4130 = vmatprep.subr.bf16.mxu0 %v4326_v2 }
 0x242   :  { %v1002_v13 = vadd.f32 %v3697_v6, %v1001_v5  ;;  %v1040_v14 = vmul.f32 %v3697_v6, %v3697_v6  ;;  %v3700_v15 = vadd.f32 %v3699_v8, %v3698_v7 }
 0x244   :  { %v1071_v16 = vadd.f32 %v1070_v12, %v1040_v14  ;;  %v1003_v17 = vadd.f32 %v3700_v15, %v1002_v13  ;;  %v1041_v18 = vmul.f32 %v3700_v15, %v3700_v15  ;;  %4131 = vmatpush3.bf16.msra.mxu0 %v4326_v2 }
 0x245   :  { %4132 = vmatprep.subr.bf16.mxu0 %v4327_v10 }
 0x246   :  { %v1072_v20 = vadd.f32 %v1071_v16, %v1041_v18  ;;  %v3701_v21 = vpop.f32.mrb[8].mxu1  ;;  %v4328_v18 = vld [vmem:[%s5219_s7 + $0x30] sm:$0xff]  }
 0x247   :  { %v3702_v22 = vpop.f32.mrb[9].mxu1 }
 0x248   :  { %v3703_v23 = vadd.f32 %v3702_v22, %v3701_v21  ;;  %v3704_v24 = vpop.f32.mrb[10].mxu1  ;;  %4133 = vmatpush3.bf16.msra.mxu0 %v4327_v10  ;;  %v4400_v10 = vmov 0.0|0.0  }
 0x249   :  { %v3705_v25 = vpop.f32.mrb[11].mxu1  ;;  %4134 = vmatprep.subr.bf16.mxu0 %v4328_v18  ;;  %4202 = vmatprep.mubr.bf16.mxu1 %v4400_v10 }
 0x24a   :  { %v1004_v27 = vadd.f32 %v3703_v23, %v1003_v17  ;;  %v1042_v28 = vmul.f32 %v3703_v23, %v3703_v23  ;;  %v3706_v59 = vadd.f32 %v3705_v25, %v3704_v24  ;;  %v4329_v25 = vld [vmem:[%s5219_s7 + $0x38] sm:$0xff]  }
 0x24c   :  { %v1073_v60 = vadd.f32 %v1072_v20, %v1042_v28  ;;  %v1005_v62 = vadd.f32 %v3706_v59, %v1004_v27  ;;  %v1043_v63 = vmul.f32 %v3706_v59, %v3706_v59  ;;  %4135 = vmatpush3.bf16.msra.mxu0 %v4328_v18 }
 0x24d   :  { %4136 = vmatprep.subr.bf16.mxu0 %v4329_v25 }
 0x24e   :  { %v1074_v3 = vadd.f32 %v1073_v60, %v1043_v63  ;;  %v3707_v4 = vpop.f32.mrb[12].mxu1 }
 0x24f   :  { %v3708_v5 = vpop.f32.mrb[13].mxu1 }
 0x250   :  { %v3709_v6 = vadd.f32 %v3708_v5, %v3707_v4  ;;  %v3710_v7 = vpop.f32.mrb[14].mxu1  ;;  %4137 = vmatpush3.bf16.msra.mxu0 %v4329_v25 }
 0x251   :  { %v3711_v8 = vpop.f32.mrb[15].mxu1 }
 0x252   :  { %v1006_v12 = vadd.f32 %v3709_v6, %v1005_v62  ;;  %v1044_v13 = vmul.f32 %v3709_v6, %v3709_v6  ;;  %v3712_v14 = vadd.f32 %v3711_v8, %v3710_v7 }
 0x254   :  { %v1075_v15 = vadd.f32 %v1074_v3, %v1044_v13  ;;  %v1007_v16 = vadd.f32 %v3712_v14, %v1006_v12  ;;  %v1045_v17 = vmul.f32 %v3712_v14, %v3712_v14 }
 0x256   :  { %v1076_v19 = vadd.f32 %v1075_v15, %v1045_v17  ;;  %v3713_v20 = vpop.f32.mrb[16].mxu1 }
 0x257   :  { %v3714_v21 = vpop.f32.mrb[17].mxu1 }
 0x258   :  { %v3715_v22 = vadd.f32 %v3714_v21, %v3713_v20  ;;  %v3716_v23 = vpop.f32.mrb[18].mxu1 }
 0x259   :  { %v3717_v24 = vpop.f32.mrb[19].mxu1 }
 0x25a   :  { %v1008_v26 = vadd.f32 %v3715_v22, %v1007_v16  ;;  %v1046_v27 = vmul.f32 %v3715_v22, %v3715_v22  ;;  %v3718_v28 = vadd.f32 %v3717_v24, %v3716_v23 }
 0x25c   :  { %v1077_v59 = vadd.f32 %v1076_v19, %v1046_v27  ;;  %v1009_v60 = vadd.f32 %v3718_v28, %v1008_v26  ;;  %v1047_v62 = vmul.f32 %v3718_v28, %v3718_v28 }
 0x25e   :  { %v1078_v63 = vadd.f32 %v1077_v59, %v1047_v62  ;;  %v3719_v1 = vpop.f32.mrb[20].mxu1 }
 0x25f   :  { %v3720_v2 = vpop.f32.mrb[21].mxu1 }
 0x260   :  { %v3721_v3 = vadd.f32 %v3720_v2, %v3719_v1  ;;  %v3722_v4 = vpop.f32.mrb[22].mxu1 }
 0x261   :  { %v3723_v5 = vpop.f32.mrb[23].mxu1 }
 0x262   :  { %v1010_v6 = vadd.f32 %v3721_v3, %v1009_v60  ;;  %v1048_v7 = vmul.f32 %v3721_v3, %v3721_v3  ;;  %v3724_v8 = vadd.f32 %v3723_v5, %v3722_v4 }
 0x264   :  { %v1079_v12 = vadd.f32 %v1078_v63, %v1048_v7  ;;  %v1011_v13 = vadd.f32 %v3724_v8, %v1010_v6  ;;  %v1049_v14 = vmul.f32 %v3724_v8, %v3724_v8 }
 0x266   :  { %v1080_v15 = vadd.f32 %v1079_v12, %v1049_v14  ;;  %v3725_v16 = vpop.f32.mrb[24].mxu1 }
 0x267   :  { %v3726_v17 = vpop.f32.mrb[25].mxu1 }
 0x268   :  { %v3727_v18 = vadd.f32 %v3726_v17, %v3725_v16  ;;  %v3728_v19 = vpop.f32.mrb[26].mxu1 }
 0x269   :  { %v3729_v20 = vpop.f32.mrb[27].mxu1 }
 0x26a   :  { %v1012_v21 = vadd.f32 %v3727_v18, %v1011_v13  ;;  %v1050_v22 = vmul.f32 %v3727_v18, %v3727_v18  ;;  %v3730_v23 = vadd.f32 %v3729_v20, %v3728_v19 }
 0x26c   :  { %v1081_v24 = vadd.f32 %v1080_v15, %v1050_v22  ;;  %v1013_v25 = vadd.f32 %v3730_v23, %v1012_v21  ;;  %v1051_v26 = vmul.f32 %v3730_v23, %v3730_v23 }
 0x26e   :  { %v1082_v27 = vadd.f32 %v1081_v24, %v1051_v26  ;;  %v3731_v28 = vpop.f32.mrb[28].mxu1 }
 0x26f   :  { %v3732_v59 = vpop.f32.mrb[29].mxu1 }
 0x270   :  { %v3733_v60 = vadd.f32 %v3732_v59, %v3731_v28  ;;  %v3734_v62 = vpop.f32.mrb[30].mxu1 }
 0x271   :  { %v3735_v63 = vpop.f32.mrb[31].mxu1 }
 0x272   :  { %v1014_v1 = vadd.f32 %v3733_v60, %v1013_v25  ;;  %v1052_v2 = vmul.f32 %v3733_v60, %v3733_v60  ;;  %v3736_v3 = vadd.f32 %v3735_v63, %v3734_v62 }
 0x274   :  { %v1083_v4 = vadd.f32 %v1082_v27, %v1052_v2  ;;  %v1015_v5 = vadd.f32 %v3736_v3, %v1014_v1  ;;  %v1053_v6 = vmul.f32 %v3736_v3, %v3736_v3 }
 0x276   :  { %v1084_v7 = vadd.f32 %v1083_v4, %v1053_v6  ;;  %v3737_v8 = vpop.f32.mrb[32].mxu1 }
 0x277   :  { %v3738_v12 = vpop.f32.mrb[33].mxu1 }
 0x278   :  { %v3739_v13 = vadd.f32 %v3738_v12, %v3737_v8  ;;  %v3740_v14 = vpop.f32.mrb[34].mxu1 }
 0x279   :  { %v3741_v15 = vpop.f32.mrb[35].mxu1 }
 0x27a   :  { %v1016_v16 = vadd.f32 %v3739_v13, %v1015_v5  ;;  %v1054_v17 = vmul.f32 %v3739_v13, %v3739_v13  ;;  %v3742_v18 = vadd.f32 %v3741_v15, %v3740_v14 }
 0x27c   :  { %v1085_v19 = vadd.f32 %v1084_v7, %v1054_v17  ;;  %v1017_v20 = vadd.f32 %v3742_v18, %v1016_v16  ;;  %v1055_v21 = vmul.f32 %v3742_v18, %v3742_v18 }
 0x27e   :  { %v1086_v22 = vadd.f32 %v1085_v19, %v1055_v21  ;;  %v3743_v23 = vpop.f32.mrb[36].mxu1 }
 0x27f   :  { %v3744_v24 = vpop.f32.mrb[37].mxu1 }
 0x280   :  { %v3745_v25 = vadd.f32 %v3744_v24, %v3743_v23  ;;  %v3746_v26 = vpop.f32.mrb[38].mxu1 }
 0x281   :  { %v3747_v27 = vpop.f32.mrb[39].mxu1 }
 0x282   :  { %v1018_v28 = vadd.f32 %v3745_v25, %v1017_v20  ;;  %v1056_v59 = vmul.f32 %v3745_v25, %v3745_v25  ;;  %v3748_v60 = vadd.f32 %v3747_v27, %v3746_v26 }
 0x284   :  { %v1087_v62 = vadd.f32 %v1086_v22, %v1056_v59  ;;  %v1019_v63 = vadd.f32 %v3748_v60, %v1018_v28  ;;  %v1057_v1 = vmul.f32 %v3748_v60, %v3748_v60 }
 0x286   :  { %v1088_v2 = vadd.f32 %v1087_v62, %v1057_v1  ;;  %v3749_v3 = vpop.f32.mrb[40].mxu1 }
 0x287   :  { %v3750_v4 = vpop.f32.mrb[41].mxu1 }
 0x288   :  { %v3751_v5 = vadd.f32 %v3750_v4, %v3749_v3  ;;  %v3752_v6 = vpop.f32.mrb[42].mxu1 }
 0x289   :  { %v3753_v7 = vpop.f32.mrb[43].mxu1 }
 0x28a   :  { %v1020_v8 = vadd.f32 %v3751_v5, %v1019_v63  ;;  %v1058_v12 = vmul.f32 %v3751_v5, %v3751_v5  ;;  %v3754_v13 = vadd.f32 %v3753_v7, %v3752_v6 }
 0x28c   :  { %v1089_v14 = vadd.f32 %v1088_v2, %v1058_v12  ;;  %v1021_v15 = vadd.f32 %v3754_v13, %v1020_v8  ;;  %v1059_v16 = vmul.f32 %v3754_v13, %v3754_v13 }
 0x28e   :  { %v1090_v17 = vadd.f32 %v1089_v14, %v1059_v16  ;;  %v3755_v18 = vpop.f32.mrb[44].mxu1 }
 0x28f   :  { %v3756_v19 = vpop.f32.mrb[45].mxu1 }
 0x290   :  { %v3757_v20 = vadd.f32 %v3756_v19, %v3755_v18  ;;  %v3758_v21 = vpop.f32.mrb[46].mxu1 }
 0x291   :  { %v3759_v22 = vpop.f32.mrb[47].mxu1 }
 0x292   :  { %v1022_v23 = vadd.f32 %v3757_v20, %v1021_v15  ;;  %v1060_v24 = vmul.f32 %v3757_v20, %v3757_v20  ;;  %v3760_v25 = vadd.f32 %v3759_v22, %v3758_v21 }
 0x294   :  { %v1091_v26 = vadd.f32 %v1090_v17, %v1060_v24  ;;  %v1023_v27 = vadd.f32 %v3760_v25, %v1022_v23  ;;  %v1061_v28 = vmul.f32 %v3760_v25, %v3760_v25 }
 0x296   :  { %v1092_v59 = vadd.f32 %v1091_v26, %v1061_v28  ;;  %v3761_v60 = vpop.f32.mrb[48].mxu1 }
 0x297   :  { %v3762_v62 = vpop.f32.mrb[49].mxu1 }
 0x298   :  { %v3763_v63 = vadd.f32 %v3762_v62, %v3761_v60  ;;  %v3764_v1 = vpop.f32.mrb[50].mxu1 }
 0x299   :  { %v3765_v2 = vpop.f32.mrb[51].mxu1 }
 0x29a   :  { %v1024_v3 = vadd.f32 %v3763_v63, %v1023_v27  ;;  %v1062_v4 = vmul.f32 %v3763_v63, %v3763_v63  ;;  %v3766_v5 = vadd.f32 %v3765_v2, %v3764_v1 }
 0x29c   :  { %v1093_v6 = vadd.f32 %v1092_v59, %v1062_v4  ;;  %v1025_v7 = vadd.f32 %v3766_v5, %v1024_v3  ;;  %v1063_v8 = vmul.f32 %v3766_v5, %v3766_v5 }
 0x29e   :  { %v1094_v12 = vadd.f32 %v1093_v6, %v1063_v8  ;;  %v3767_v13 = vpop.f32.mrb[52].mxu1 }
 0x29f   :  { %v3768_v14 = vpop.f32.mrb[53].mxu1 }
 0x2a0   :  { %v3769_v15 = vadd.f32 %v3768_v14, %v3767_v13  ;;  %v3770_v16 = vpop.f32.mrb[54].mxu1 }
 0x2a1   :  { %v3771_v17 = vpop.f32.mrb[55].mxu1 }
 0x2a2   :  { %v1026_v18 = vadd.f32 %v3769_v15, %v1025_v7  ;;  %v1064_v19 = vmul.f32 %v3769_v15, %v3769_v15  ;;  %v3772_v20 = vadd.f32 %v3771_v17, %v3770_v16 }
 0x2a4   :  { %v1095_v21 = vadd.f32 %v1094_v12, %v1064_v19  ;;  %v1027_v22 = vadd.f32 %v3772_v20, %v1026_v18  ;;  %v1065_v23 = vmul.f32 %v3772_v20, %v3772_v20 }
 0x2a6   :  { %v1096_v24 = vadd.f32 %v1095_v21, %v1065_v23  ;;  %v3773_v25 = vpop.f32.mrb[56].mxu1 }
 0x2a7   :  { %v3774_v26 = vpop.f32.mrb[57].mxu1 }
 0x2a8   :  { %v3775_v27 = vadd.f32 %v3774_v26, %v3773_v25  ;;  %v3776_v28 = vpop.f32.mrb[58].mxu1 }
 0x2a9   :  { %v3777_v59 = vpop.f32.mrb[59].mxu1 }
 0x2aa   :  { %v1028_v60 = vadd.f32 %v3775_v27, %v1027_v22  ;;  %v1066_v62 = vmul.f32 %v3775_v27, %v3775_v27  ;;  %v3778_v63 = vadd.f32 %v3777_v59, %v3776_v28 }
 0x2ac   :  { %v1097_v1 = vadd.f32 %v1096_v24, %v1066_v62  ;;  %v1029_v2 = vadd.f32 %v3778_v63, %v1028_v60  ;;  %v1067_v3 = vmul.f32 %v3778_v63, %v3778_v63 }
 0x2ae   :  { %v1098_v4 = vadd.f32 %v1097_v1, %v1067_v3  ;;  %v3779_v5 = vpop.f32.mrb[60].mxu1 }
 0x2af   :  { %v3780_v6 = vpop.f32.mrb[61].mxu1 }
 0x2b0   :  { %v3781_v7 = vadd.f32 %v3780_v6, %v3779_v5  ;;  %v3782_v8 = vpop.f32.mrb[62].mxu1 }
 0x2b1   :  { %v3783_v12 = vpop.f32.mrb[63].mxu1 }
 0x2b2   :  { %v1030_v13 = vadd.f32 %v3781_v7, %v1029_v2  ;;  %v1068_v14 = vmul.f32 %v3781_v7, %v3781_v7  ;;  %v3784_v15 = vadd.f32 %v3783_v12, %v3782_v8  ;;  %v3623_v12 = vld [vmem:[%s5217_s5] ss:$0 sm:$0xff] }
 0x2b4   :  { %v1099_v16 = vadd.f32 %v1098_v4, %v1068_v14  ;;  %v1031_v17 = vadd.f32 %v3784_v15, %v1030_v13  ;;  %v1069_v18 = vmul.f32 %v3784_v15, %v3784_v15  ;;  %v3624_v15 = vld [vmem:[%s5218_s6] ss:$0 sm:$0xff] }
 0x2b6   :  { %v1032_v19 = vrot.slane %v1031_v17, 4  ;;  %v1100_v20 = vadd.f32 %v1099_v16, %v1069_v18 }
 0x2b8   :  { %v1033_v21 = vadd.f32 %v1032_v19, %v1031_v17  ;;  %v1101_v22 = vrot.slane %v1100_v20, 4 }
 0x2ba   :  { %v1034_v23 = vrot.slane %v1033_v21, 2  ;;  %v1102_v24 = vadd.f32 %v1101_v22, %v1100_v20 }
 0x2bc   :  { %v1035_v25 = vadd.f32 %v1034_v23, %v1033_v21  ;;  %v1103_v26 = vrot.slane %v1102_v24, 2 }
 0x2be   :  { %v1036_v27 = vrot.slane %v1035_v25, 1  ;;  %v1104_v28 = vadd.f32 %v1103_v26, %v1102_v24  ;;  %v4921_v24 = vld [vmem:[%s5220_s8] ss:$0 sm:$0xff] }
 0x2c0   :  { %v1037_v59 = vadd.f32 %v1036_v27, %v1035_v25  ;;  %v1105_v60 = vrot.slane %v1104_v28, 1 }
 0x2c2   :  { %v1106_v62 = vadd.f32 %v1105_v60, %v1104_v28  ;;  %v1107_v63 = vmul.f32 0.0625, %v1037_v59 }
 0x2c4   :  { %v1108_v1 = vmul.f32 0.0625, %v1106_v62  ;;  %v1109_v2 = vmul.f32 %v1107_v63, %v1107_v63  ;;  %v1112_v6 = vsub.f32 %v4859_v61, %v1107_v63  ;;  %v1113_v7 = vsub.f32 %v4861_v0, %v1107_v63 }
 0x2c6   :  { %v1110_v3 = vsub.f32 %v1108_v1, %v1109_v2 }
 0x2c8   :  { %v1111_v4 = vmax.f32 %v1110_v3, 0.0 }
 0x2ca   :  { %v1144_v5 = vadd.f32 1e-05, %v1111_v4 }
 0x2cc   :  { %4338 = vrsqrt.f32 %v1144_v5 }
 0x2d6   :  { %v4339_v8 = vpop.eup %4338 }
 0x2d7   :  { %v1146_v13 = vmul.f32 %v4339_v8, %v1112_v6  ;;  %v1147_v14 = vmul.f32 %v4339_v8, %v1113_v7 }
 0x2d9   :  { %v1185_v16 = vmul.f32 %v3623_v12, %v1146_v13  ;;  %v1186_v17 = vmul.f32 %v3623_v12, %v1147_v14 }
 0x2db   :  { %v1224_v18 = vadd.f32 %v3624_v15, %v1185_v16  ;;  %v1225_v19 = vadd.f32 %v3624_v15, %v1186_v17 }
 0x2dd   :  { %vm1256_vm0 = vcmp.gt.f32.partialorder %v1224_v18, 0.0  ;;  %vm1257_vm1 = vcmp.gt.f32.partialorder %v1225_v19, 0.0  ;;  %v1288_v61 = vmul.f32 0.1, %v1224_v18  ;;  %v1289_v20 = vmul.f32 0.1, %v1225_v19 }
 0x2df   :  { %v1320_v0 = vsel %vm1256_vm0, %v1224_v18, %v1288_v61  ;;  %v1321_v21 = vsel %vm1257_vm1, %v1225_v19, %v1289_v20 }
 0x2e0   :  { %v1448_v22 = vpack.c.bf16 %v1321_v21, %v1320_v0 }
 0x2e2   :  { %4138 = vmatprep.mubr.bf16.mxu0 %v1448_v22 }
 0x2e3   :  { %4139 = vmatmul.mubr.bf16.vlgmr.msra.gmra.mrb[32].mxu0 %v4400_v10 }
 0x2e4   :  { %4142 = vmatprep.mubr.bf16.mxu0 %v4400_v10 }
 0x2eb   :  { %4143 = vmatmul.mubr.bf16.gmra.mrb[36].mxu0 %v4400_v10 }
 0x2ec   :  { %4146 = vmatprep.mubr.bf16.mxu0 %v4400_v10 }
 0x2f3   :  { %4147 = vmatmul.mubr.bf16.gmra.mrb[40].mxu0 %v4400_v10 }
 0x2f4   :  { %4150 = vmatprep.mubr.bf16.mxu0 %v4400_v10 }
 0x2fb   :  { %4151 = vmatmul.mubr.bf16.gmra.mrb[44].mxu0 %v4400_v10 }
 0x2fc   :  { %4154 = vmatprep.mubr.bf16.mxu0 %v4400_v10 }
 0x303   :  { %4155 = vmatmul.mubr.bf16.gmra.mrb[48].mxu0 %v4400_v10 }
 0x304   :  { %4158 = vmatprep.mubr.bf16.mxu0 %v4400_v10 }
 0x30b   :  { %4159 = vmatmul.mubr.bf16.gmra.mrb[52].mxu0 %v4400_v10 }
 0x30c   :  { %4162 = vmatprep.mubr.bf16.mxu0 %v4400_v10 }
 0x313   :  { %4163 = vmatmul.mubr.bf16.gmra.mrb[56].mxu0 %v4400_v10 }
 0x314   :  { %4166 = vmatprep.mubr.bf16.mxu0 %v4400_v10 }
 0x31b   :  { %4167 = vmatmul.mubr.bf16.gmra.mrb[60].mxu0 %v4400_v10 }
 0x31c   :  { %1744 = vmatprep.mubr.bf16.mxu0 %v4717_v9 }
 0x3b6   :  { %v4140_v23 = vpop.f32.mrb[32].mxu0 }
 0x3b7   :  { %v1569_v25 = vpop.f32.mrb[33].mxu0  ;;  %v1578_v27 = vadd.f32 %v4140_v23, %v4921_v24 }
 0x3b8   :  { %v4141_v26 = vpop.f32.mrb[34].mxu0  ;;  %v1570_v60 = vadd.f32 %v4921_v24, %v1569_v25 }
 0x3b9   :  { %v1581_v28 = vadd.f32 %v4141_v26, %v4921_v24  ;;  %v1572_v59 = vpop.f32.mrb[35].mxu0 }
 0x3ba   :  { %v1573_v62 = vadd.f32 %v4921_v24, %v1572_v59 }
 0x3bb   :  { %v1697_v63 = vpack.c.bf16 %v1581_v28, %v1578_v27 }
 0x3bc   :  { %v1696_v1 = vpack.c.bf16 %v1573_v62, %v1570_v60 }
 0x3be   :  { %v4144_v9 = vpop.f32.mrb[36].mxu0 }
 0x3bf   :  { %v1585_v2 = vpop.f32.mrb[37].mxu0  ;;  %v4928_v4 = vadd.f32 %v4144_v9, %v4921_v24 }
 0x3c0   :  { %v4145_v3 = vpop.f32.mrb[38].mxu0  ;;  %v1586_v7 = vadd.f32 %v4921_v24, %v1585_v2 }
 0x3c1   :  { %v1597_v5 = vadd.f32 %v4145_v3, %v4921_v24  ;;  %v1588_v6 = vpop.f32.mrb[39].mxu0 }
 0x3c2   :  { %v1589_v8 = vadd.f32 %v4921_v24, %v1588_v6 }
 0x3c3   :  { %v1699_v12 = vpack.c.bf16 %v1597_v5, %v4928_v4 }
 0x3c4   :  { %v1698_v13 = vpack.c.bf16 %v1589_v8, %v1586_v7 }
 0x3c6   :  { %v4148_v14 = vpop.f32.mrb[40].mxu0 }
 0x3c7   :  { %v1601_v15 = vpop.f32.mrb[41].mxu0  ;;  %v4935_v17 = vadd.f32 %v4148_v14, %v4921_v24 }
 0x3c8   :  { %v4149_v16 = vpop.f32.mrb[42].mxu0  ;;  %v1602_v61 = vadd.f32 %v4921_v24, %v1601_v15 }
 0x3c9   :  { %v4938_v18 = vadd.f32 %v4149_v16, %v4921_v24  ;;  %v1604_v19 = vpop.f32.mrb[43].mxu0 }
 0x3ca   :  { %v1605_v20 = vadd.f32 %v4921_v24, %v1604_v19 }
 0x3cb   :  { %v1701_v0 = vpack.c.bf16 %v4938_v18, %v4935_v17 }
 0x3cc   :  { %v1700_v21 = vpack.c.bf16 %v1605_v20, %v1602_v61 }
 0x3ce   :  { %v4152_v22 = vpop.f32.mrb[44].mxu0 }
 0x3cf   :  { %v1617_v23 = vpop.f32.mrb[45].mxu0  ;;  %v1626_v26 = vadd.f32 %v4152_v22, %v4921_v24 }
 0x3d0   :  { %v4153_v25 = vpop.f32.mrb[46].mxu0  ;;  %v1618_v59 = vadd.f32 %v4921_v24, %v1617_v23 }
 0x3d1   :  { %v1629_v27 = vadd.f32 %v4153_v25, %v4921_v24  ;;  %v1620_v28 = vpop.f32.mrb[47].mxu0 }
 0x3d2   :  { %v1621_v60 = vadd.f32 %v4921_v24, %v1620_v28 }
 0x3d3   :  { %v1703_v62 = vpack.c.bf16 %v1629_v27, %v1626_v26 }
 0x3d4   :  { %v1702_v9 = vpack.c.bf16 %v1621_v60, %v1618_v59 }
 0x3d6   :  { %v4156_v2 = vpop.f32.mrb[48].mxu0 }
 0x3d7   :  { %v1633_v3 = vpop.f32.mrb[49].mxu0  ;;  %v1642_v5 = vadd.f32 %v4156_v2, %v4921_v24 }
 0x3d8   :  { %v4157_v4 = vpop.f32.mrb[50].mxu0  ;;  %v1634_v8 = vadd.f32 %v4921_v24, %v1633_v3 }
 0x3d9   :  { %v1645_v6 = vadd.f32 %v4157_v4, %v4921_v24  ;;  %v1636_v7 = vpop.f32.mrb[51].mxu0 }
 0x3da   :  { %v1637_v14 = vadd.f32 %v4921_v24, %v1636_v7 }
 0x3db   :  { %v1705_v15 = vpack.c.bf16 %v1645_v6, %v1642_v5 }
 0x3dc   :  { %v1704_v16 = vpack.c.bf16 %v1637_v14, %v1634_v8 }
 0x3de   :  { %v4160_v17 = vpop.f32.mrb[52].mxu0  ;;  %3809 = vmatprep.subr.bf16.mxu0 %v1704_v16 }
 0x3df   :  { %v1649_v18 = vpop.f32.mrb[53].mxu0  ;;  %3810 = vmatpush3.bf16.msra.mxu0 %v1696_v1  ;;  %v1658_v61 = vadd.f32 %v4160_v17, %v4921_v24 }
 0x3e0   :  { %v4161_v19 = vpop.f32.mrb[54].mxu0  ;;  %3811 = vmatprep.subr.bf16.mxu0 %v1705_v15  ;;  %v1650_v23 = vadd.f32 %v4921_v24, %v1649_v18 }
 0x3e1   :  { %v1661_v20 = vadd.f32 %v4161_v19, %v4921_v24  ;;  %v1652_v22 = vpop.f32.mrb[55].mxu0 }
 0x3e2   :  { %v1653_v25 = vadd.f32 %v4921_v24, %v1652_v22  ;;  %v4335_v22 = vld [vmem:[%s5223_s11 + $0x28] sm:$0xff]  }
 0x3e3   :  { %v1707_v26 = vpack.c.bf16 %v1661_v20, %v1658_v61  ;;  %3812 = vmatpush3.bf16.msra.mxu0 %v1697_v63  ;;  %v4334_v20 = vld [vmem:[%s5223_s11 + $0x20] sm:$0xff]  }
 0x3e4   :  { %v1706_v27 = vpack.c.bf16 %v1653_v25, %v1650_v23 }
 0x3e6   :  { %v4164_v28 = vpop.f32.mrb[56].mxu0  ;;  %3813 = vmatprep.subr.bf16.mxu0 %v1706_v27 }
 0x3e7   :  { %v1665_v59 = vpop.f32.mrb[57].mxu0  ;;  %3814 = vmatpush3.bf16.msra.mxu0 %v1698_v13  ;;  %v1674_v1 = vadd.f32 %v4164_v28, %v4921_v24 }
 0x3e8   :  { %v4165_v60 = vpop.f32.mrb[58].mxu0  ;;  %3815 = vmatprep.subr.bf16.mxu0 %v1707_v26  ;;  %v1666_v4 = vadd.f32 %v4921_v24, %v1665_v59 }
 0x3e9   :  { %v1677_v2 = vadd.f32 %v4165_v60, %v4921_v24  ;;  %v1668_v3 = vpop.f32.mrb[59].mxu0  ;;  %v4336_v60 = vld [vmem:[%s5223_s11 + $0x30] sm:$0xff]  }
 0x3ea   :  { %v1669_v5 = vadd.f32 %v4921_v24, %v1668_v3 }
 0x3eb   :  { %v1709_v6 = vpack.c.bf16 %v1677_v2, %v1674_v1  ;;  %3816 = vmatpush3.bf16.msra.mxu0 %v1699_v12 }
 0x3ec   :  { %v1708_v7 = vpack.c.bf16 %v1669_v5, %v1666_v4 }
 0x3ee   :  { %v4168_v63 = vpop.f32.mrb[60].mxu0  ;;  %3817 = vmatprep.subr.bf16.mxu0 %v1708_v7  ;;  %v4337_v7 = vld [vmem:[%s5223_s11 + $0x38] sm:$0xff]  }
 0x3ef   :  { %v1681_v8 = vpop.f32.mrb[61].mxu0  ;;  %3818 = vmatpush3.bf16.msra.mxu0 %v1700_v21  ;;  %v1690_v13 = vadd.f32 %v4168_v63, %v4921_v24 }
 0x3f0   :  { %v4169_v14 = vpop.f32.mrb[62].mxu0  ;;  %3819 = vmatprep.subr.bf16.mxu0 %v1709_v6  ;;  %v1682_v17 = vadd.f32 %v4921_v24, %v1681_v8 }
 0x3f1   :  { %v1693_v15 = vadd.f32 %v4169_v14, %v4921_v24  ;;  %v1684_v16 = vpop.f32.mrb[63].mxu0 }
 0x3f2   :  { %v1685_v18 = vadd.f32 %v4921_v24, %v1684_v16 }
 0x3f3   :  { %v1711_v19 = vpack.c.bf16 %v1693_v15, %v1690_v13  ;;  %3820 = vmatpush3.bf16.msra.mxu0 %v1701_v0 }
 0x3f4   :  { %v1710_v61 = vpack.c.bf16 %v1685_v18, %v1682_v17 }
 0x3f6   :  { %3821 = vmatprep.subr.bf16.mxu0 %v1710_v61 }
 0x3f7   :  { %3822 = vmatpush3.bf16.msra.mxu0 %v1702_v9 }
 0x3f8   :  { %3823 = vmatprep.subr.bf16.mxu0 %v1711_v19 }
 0x3fb   :  { %3824 = vmatpush3.bf16.msra.mxu0 %v1703_v62 }
 0x3fe   :  { %1745 = vmatmul.mubr.bf16.vlgmr.msra.gmra.mrb[64].mxu0 %v4766_v29  ;;  %v4330_v29 = vld [vmem:[%s5223_s11] sm:$0xff]  }
 0x3ff   :  { %1752 = vmatprep.mubr.bf16.mxu0 %v4768_v30  ;;  %4277 = vmatprep.subr.bf16.mxu1 %v4330_v29  ;;  %v4331_v30 = vld [vmem:[%s5223_s11 + $0x8] sm:$0xff]  }
 0x400   :  { %4170 = vmatprep.subr.bf16.mxu0 %v4330_v29  ;;  %4285 = vmatpush3.bf16.msra.mxu1 %v4330_v29 }
 0x401   :  { %4171 = vmatpush3.bf16.msra.mxu0 %v4330_v29  ;;  %4278 = vmatprep.subr.bf16.mxu1 %v4331_v30 }
 0x402   :  { %4172 = vmatprep.subr.bf16.mxu0 %v4331_v30 }
 0x404   :  { %4286 = vmatpush3.bf16.msra.mxu1 %v4331_v30 }
 0x405   :  { %4173 = vmatpush3.bf16.msra.mxu0 %v4331_v30 }
 0x406   :  { %1753 = vmatmul.mubr.bf16.gmra.mrb[68].mxu0 %v4772_v31  ;;  %v4332_v31 = vld [vmem:[%s5223_s11 + $0x10] sm:$0xff]  }
 0x407   :  { %1760 = vmatprep.mubr.bf16.mxu0 %v4774_v32  ;;  %4279 = vmatprep.subr.bf16.mxu1 %v4332_v31 }
 0x408   :  { %4174 = vmatprep.subr.bf16.mxu0 %v4332_v31  ;;  %4287 = vmatpush3.bf16.msra.mxu1 %v4332_v31 }
 0x409   :  { %4175 = vmatpush3.bf16.msra.mxu0 %v4332_v31 }
 0x40e   :  { %1761 = vmatmul.mubr.bf16.gmra.mrb[72].mxu0 %v4778_v11 }
 0x40f   :  { %1768 = vmatprep.mubr.bf16.mxu0 %v4780_v33 }
 0x416   :  { %1769 = vmatmul.mubr.bf16.gmra.mrb[76].mxu0 %v4784_v34 }
 0x417   :  { %1776 = vmatprep.mubr.bf16.mxu0 %v4786_v35 }
 0x41e   :  { %1777 = vmatmul.mubr.bf16.gmra.mrb[80].mxu0 %v4790_v36 }
 0x41f   :  { %1784 = vmatprep.mubr.bf16.mxu0 %v4792_v37 }
 0x426   :  { %1785 = vmatmul.mubr.bf16.gmra.mrb[84].mxu0 %v4796_v38 }
 0x427   :  { %1792 = vmatprep.mubr.bf16.mxu0 %v4798_v39 }
 0x42e   :  { %1793 = vmatmul.mubr.bf16.gmra.mrb[88].mxu0 %v4802_v40 }
 0x42f   :  { %1800 = vmatprep.mubr.bf16.mxu0 %v4804_v41 }
 0x436   :  { %1801 = vmatmul.mubr.bf16.gmra.mrb[92].mxu0 %v4808_v42 }
 0x437   :  { %1808 = vmatprep.mubr.bf16.mxu0 %v4810_v43 }
 0x43e   :  { %1809 = vmatmul.mubr.bf16.gmra.mrb[96].mxu0 %v4814_v44 }
 0x43f   :  { %1816 = vmatprep.mubr.bf16.mxu0 %v4816_v45 }
 0x446   :  { %1817 = vmatmul.mubr.bf16.gmra.mrb[100].mxu0 %v4820_v46 }
 0x447   :  { %1824 = vmatprep.mubr.bf16.mxu0 %v4822_v47 }
 0x44e   :  { %1825 = vmatmul.mubr.bf16.gmra.mrb[104].mxu0 %v4826_v48 }
 0x44f   :  { %1832 = vmatprep.mubr.bf16.mxu0 %v4828_v49 }
 0x456   :  { %1833 = vmatmul.mubr.bf16.gmra.mrb[108].mxu0 %v4832_v50 }
 0x457   :  { %1840 = vmatprep.mubr.bf16.mxu0 %v4834_v51 }
 0x45e   :  { %1841 = vmatmul.mubr.bf16.gmra.mrb[112].mxu0 %v4838_v52 }
 0x45f   :  { %1848 = vmatprep.mubr.bf16.mxu0 %v4840_v53 }
 0x466   :  { %1849 = vmatmul.mubr.bf16.gmra.mrb[116].mxu0 %v4844_v54 }
 0x467   :  { %1856 = vmatprep.mubr.bf16.mxu0 %v4846_v55 }
 0x46e   :  { %1857 = vmatmul.mubr.bf16.gmra.mrb[120].mxu0 %v4850_v56 }
 0x46f   :  { %1864 = vmatprep.mubr.bf16.mxu0 %v4852_v57 }
 0x476   :  { %1865 = vmatmul.mubr.bf16.gmra.mrb[124].mxu0 %v4856_v58  ;;  %v4333_v58 = vld [vmem:[%s5223_s11 + $0x18] sm:$0xff]  }
 0x477   :  { %4280 = vmatprep.subr.bf16.mxu1 %v4333_v58  ;;  %4176 = vmatprep.subr.bf16.mxu0 %v4333_v58 }
 0x478   :  { %4288 = vmatpush3.bf16.msra.mxu1 %v4333_v58  ;;  %4177 = vmatpush3.bf16.msra.mxu0 %v4333_v58 }
 0x479   :  { %4281 = vmatprep.subr.bf16.mxu1 %v4334_v20  ;;  %4178 = vmatprep.subr.bf16.mxu0 %v4334_v20 }
 0x47c   :  { %4289 = vmatpush3.bf16.msra.mxu1 %v4334_v20  ;;  %4179 = vmatpush3.bf16.msra.mxu0 %v4334_v20 }
 0x47d   :  { %4282 = vmatprep.subr.bf16.mxu1 %v4335_v22  ;;  %4180 = vmatprep.subr.bf16.mxu0 %v4335_v22 }
 0x480   :  { %4290 = vmatpush3.bf16.msra.mxu1 %v4335_v22  ;;  %4181 = vmatpush3.bf16.msra.mxu0 %v4335_v22 }
 0x481   :  { %4283 = vmatprep.subr.bf16.mxu1 %v4336_v60  ;;  %4182 = vmatprep.subr.bf16.mxu0 %v4336_v60 }
 0x484   :  { %4291 = vmatpush3.bf16.msra.mxu1 %v4336_v60  ;;  %4183 = vmatpush3.bf16.msra.mxu0 %v4336_v60  ;;  %v4366_v60 = vld [vmem:[#allocation2 + $0x8] sm:$0xff] }
 0x485   :  { %4284 = vmatprep.subr.bf16.mxu1 %v4337_v7  ;;  %4184 = vmatprep.subr.bf16.mxu0 %v4337_v7 }
 0x488   :  { %4292 = vmatpush3.bf16.msra.mxu1 %v4337_v7  ;;  %4185 = vmatpush3.bf16.msra.mxu0 %v4337_v7 }
 0x489   :  { %4253 = vmatprep.subr.bf16.mxu0 %v4400_v10 }
 0x48b   :  { %4203 = vmatmul.mubr.bf16.vlgmr.msra.gmra.mrb[64].mxu1 %v4400_v10 }
 0x48c   :  { %4206 = vmatprep.mubr.bf16.mxu1 %v4400_v10 }
 0x493   :  { %4207 = vmatmul.mubr.bf16.gmra.mrb[68].mxu1 %v4400_v10 }
 0x494   :  { %4210 = vmatprep.mubr.bf16.mxu1 %v4400_v10 }
 0x49b   :  { %4211 = vmatmul.mubr.bf16.gmra.mrb[72].mxu1 %v4400_v10 }
 0x49c   :  { %4214 = vmatprep.mubr.bf16.mxu1 %v4400_v10 }
 0x4a3   :  { %4215 = vmatmul.mubr.bf16.gmra.mrb[76].mxu1 %v4400_v10 }
 0x4a4   :  { %2552 = vmatprep.mubr.bf16.mxu1 %v4366_v60 }
 0x4d1   :  { %v3825_v32 = vpop.f32.mrb[64].mxu0 }
 0x4d2   :  { %v3826_v11 = vpop.f32.mrb[65].mxu0 }
 0x4d3   :  { %v5004_v33 = vadd.f32 %v3826_v11, %v3825_v32  ;;  %v3828_v34 = vpop.f32.mrb[66].mxu0 }
 0x4d4   :  { %v3829_v35 = vpop.f32.mrb[67].mxu0 }
 0x4d5   :  { %v5006_v36 = vadd.f32 %v3829_v35, %v3828_v34  ;;  %v1910_v40 = vmul.f32 %v5004_v33, %v5004_v33 }
 0x4d7   :  { %v1911_v37 = vmul.f32 %v5006_v36, %v5006_v36  ;;  %v1873_v41 = vadd.f32 %v5006_v36, %v5004_v33 }
 0x4d9   :  { %v3831_v38 = vpop.f32.mrb[68].mxu0  ;;  %v1942_v45 = vadd.f32 %v1911_v37, %v1910_v40 }
 0x4da   :  { %v3832_v39 = vpop.f32.mrb[69].mxu0 }
 0x4db   :  { %v3833_v42 = vadd.f32 %v3832_v39, %v3831_v38  ;;  %v3834_v43 = vpop.f32.mrb[70].mxu0 }
 0x4dc   :  { %v3835_v44 = vpop.f32.mrb[71].mxu0 }
 0x4dd   :  { %v1874_v46 = vadd.f32 %v3833_v42, %v1873_v41  ;;  %v1912_v47 = vmul.f32 %v3833_v42, %v3833_v42  ;;  %v3836_v48 = vadd.f32 %v3835_v44, %v3834_v43 }
 0x4df   :  { %v1943_v49 = vadd.f32 %v1942_v45, %v1912_v47  ;;  %v1875_v50 = vadd.f32 %v3836_v48, %v1874_v46  ;;  %v1913_v51 = vmul.f32 %v3836_v48, %v3836_v48 }
 0x4e1   :  { %v1944_v52 = vadd.f32 %v1943_v49, %v1913_v51  ;;  %v3837_v53 = vpop.f32.mrb[72].mxu0 }
 0x4e2   :  { %v3838_v54 = vpop.f32.mrb[73].mxu0 }
 0x4e3   :  { %v3839_v55 = vadd.f32 %v3838_v54, %v3837_v53  ;;  %v3840_v56 = vpop.f32.mrb[74].mxu0 }
 0x4e4   :  { %v3841_v57 = vpop.f32.mrb[75].mxu0 }
 0x4e5   :  { %v1876_v24 = vadd.f32 %v3839_v55, %v1875_v50  ;;  %v1914_v12 = vmul.f32 %v3839_v55, %v3839_v55  ;;  %v3842_v0 = vadd.f32 %v3841_v57, %v3840_v56 }
 0x4e7   :  { %v1945_v21 = vadd.f32 %v1944_v52, %v1914_v12  ;;  %v1877_v62 = vadd.f32 %v3842_v0, %v1876_v24  ;;  %v1915_v9 = vmul.f32 %v3842_v0, %v3842_v0 }
 0x4e9   :  { %v1946_v23 = vadd.f32 %v1945_v21, %v1915_v9  ;;  %v3843_v25 = vpop.f32.mrb[76].mxu0 }
 0x4ea   :  { %v3844_v26 = vpop.f32.mrb[77].mxu0 }
 0x4eb   :  { %v3845_v27 = vadd.f32 %v3844_v26, %v3843_v25  ;;  %v3846_v28 = vpop.f32.mrb[78].mxu0 }
 0x4ec   :  { %v3847_v59 = vpop.f32.mrb[79].mxu0 }
 0x4ed   :  { %v1878_v1 = vadd.f32 %v3845_v27, %v1877_v62  ;;  %v1916_v2 = vmul.f32 %v3845_v27, %v3845_v27  ;;  %v3848_v3 = vadd.f32 %v3847_v59, %v3846_v28 }
 0x4ef   :  { %v1947_v4 = vadd.f32 %v1946_v23, %v1916_v2  ;;  %v1879_v5 = vadd.f32 %v3848_v3, %v1878_v1  ;;  %v1917_v6 = vmul.f32 %v3848_v3, %v3848_v3 }
 0x4f1   :  { %v1948_v63 = vadd.f32 %v1947_v4, %v1917_v6  ;;  %v3849_v8 = vpop.f32.mrb[80].mxu0 }
 0x4f2   :  { %v3850_v14 = vpop.f32.mrb[81].mxu0 }
 0x4f3   :  { %v3851_v13 = vadd.f32 %v3850_v14, %v3849_v8  ;;  %v3852_v15 = vpop.f32.mrb[82].mxu0 }
 0x4f4   :  { %v3853_v16 = vpop.f32.mrb[83].mxu0 }
 0x4f5   :  { %v1880_v17 = vadd.f32 %v3851_v13, %v1879_v5  ;;  %v1918_v18 = vmul.f32 %v3851_v13, %v3851_v13  ;;  %v3854_v19 = vadd.f32 %v3853_v16, %v3852_v15 }
 0x4f7   :  { %v1949_v61 = vadd.f32 %v1948_v63, %v1918_v18  ;;  %v1881_v29 = vadd.f32 %v3854_v19, %v1880_v17  ;;  %v1919_v30 = vmul.f32 %v3854_v19, %v3854_v19 }
 0x4f9   :  { %v1950_v31 = vadd.f32 %v1949_v61, %v1919_v30  ;;  %v3855_v32 = vpop.f32.mrb[84].mxu0 }
 0x4fa   :  { %v3856_v11 = vpop.f32.mrb[85].mxu0 }
 0x4fb   :  { %v3857_v34 = vadd.f32 %v3856_v11, %v3855_v32  ;;  %v3858_v35 = vpop.f32.mrb[86].mxu0 }
 0x4fc   :  { %v3859_v37 = vpop.f32.mrb[87].mxu0 }
 0x4fd   :  { %v1882_v38 = vadd.f32 %v3857_v34, %v1881_v29  ;;  %v1920_v39 = vmul.f32 %v3857_v34, %v3857_v34  ;;  %v3860_v40 = vadd.f32 %v3859_v37, %v3858_v35 }
 0x4ff   :  { %v1951_v41 = vadd.f32 %v1950_v31, %v1920_v39  ;;  %v1883_v42 = vadd.f32 %v3860_v40, %v1882_v38  ;;  %v1921_v43 = vmul.f32 %v3860_v40, %v3860_v40 }
 0x501   :  { %v1952_v44 = vadd.f32 %v1951_v41, %v1921_v43  ;;  %v3861_v45 = vpop.f32.mrb[88].mxu0 }
 0x502   :  { %v3862_v46 = vpop.f32.mrb[89].mxu0 }
 0x503   :  { %v3863_v47 = vadd.f32 %v3862_v46, %v3861_v45  ;;  %v3864_v48 = vpop.f32.mrb[90].mxu0 }
 0x504   :  { %v3865_v49 = vpop.f32.mrb[91].mxu0 }
 0x505   :  { %v1884_v50 = vadd.f32 %v3863_v47, %v1883_v42  ;;  %v1922_v51 = vmul.f32 %v3863_v47, %v3863_v47  ;;  %v3866_v52 = vadd.f32 %v3865_v49, %v3864_v48 }
 0x507   :  { %v1953_v53 = vadd.f32 %v1952_v44, %v1922_v51  ;;  %v1885_v54 = vadd.f32 %v3866_v52, %v1884_v50  ;;  %v1923_v55 = vmul.f32 %v3866_v52, %v3866_v52 }
 0x509   :  { %v1954_v56 = vadd.f32 %v1953_v53, %v1923_v55  ;;  %v3867_v57 = vpop.f32.mrb[92].mxu0 }
 0x50a   :  { %v3868_v58 = vpop.f32.mrb[93].mxu0 }
 0x50b   :  { %v3869_v24 = vadd.f32 %v3868_v58, %v3867_v57  ;;  %v3870_v12 = vpop.f32.mrb[94].mxu0 }
 0x50c   :  { %v3871_v0 = vpop.f32.mrb[95].mxu0 }
 0x50d   :  { %v1886_v21 = vadd.f32 %v3869_v24, %v1885_v54  ;;  %v1924_v62 = vmul.f32 %v3869_v24, %v3869_v24  ;;  %v3872_v9 = vadd.f32 %v3871_v0, %v3870_v12 }
 0x50f   :  { %v1955_v20 = vadd.f32 %v1954_v56, %v1924_v62  ;;  %v1887_v22 = vadd.f32 %v3872_v9, %v1886_v21  ;;  %v1925_v23 = vmul.f32 %v3872_v9, %v3872_v9 }
 0x511   :  { %v1956_v25 = vadd.f32 %v1955_v20, %v1925_v23  ;;  %v3873_v26 = vpop.f32.mrb[96].mxu0 }
 0x512   :  { %v3874_v27 = vpop.f32.mrb[97].mxu0 }
 0x513   :  { %v3875_v28 = vadd.f32 %v3874_v27, %v3873_v26  ;;  %v3876_v59 = vpop.f32.mrb[98].mxu0 }
 0x514   :  { %v3877_v1 = vpop.f32.mrb[99].mxu0 }
 0x515   :  { %v1888_v2 = vadd.f32 %v3875_v28, %v1887_v22  ;;  %v1926_v3 = vmul.f32 %v3875_v28, %v3875_v28  ;;  %v3878_v4 = vadd.f32 %v3877_v1, %v3876_v59 }
 0x517   :  { %v1957_v5 = vadd.f32 %v1956_v25, %v1926_v3  ;;  %v1889_v6 = vadd.f32 %v3878_v4, %v1888_v2  ;;  %v1927_v7 = vmul.f32 %v3878_v4, %v3878_v4 }
 0x519   :  { %v1958_v63 = vadd.f32 %v1957_v5, %v1927_v7  ;;  %v3879_v8 = vpop.f32.mrb[100].mxu0 }
 0x51a   :  { %v3880_v14 = vpop.f32.mrb[101].mxu0 }
 0x51b   :  { %v3881_v13 = vadd.f32 %v3880_v14, %v3879_v8  ;;  %v3882_v15 = vpop.f32.mrb[102].mxu0 }
 0x51c   :  { %v3883_v16 = vpop.f32.mrb[103].mxu0 }
 0x51d   :  { %v1890_v17 = vadd.f32 %v3881_v13, %v1889_v6  ;;  %v1928_v18 = vmul.f32 %v3881_v13, %v3881_v13  ;;  %v3884_v19 = vadd.f32 %v3883_v16, %v3882_v15 }
 0x51f   :  { %v1959_v61 = vadd.f32 %v1958_v63, %v1928_v18  ;;  %v1891_v29 = vadd.f32 %v3884_v19, %v1890_v17  ;;  %v1929_v30 = vmul.f32 %v3884_v19, %v3884_v19 }
 0x521   :  { %v1960_v31 = vadd.f32 %v1959_v61, %v1929_v30  ;;  %v3885_v32 = vpop.f32.mrb[104].mxu0 }
 0x522   :  { %v3886_v11 = vpop.f32.mrb[105].mxu0 }
 0x523   :  { %v3887_v34 = vadd.f32 %v3886_v11, %v3885_v32  ;;  %v3888_v35 = vpop.f32.mrb[106].mxu0 }
 0x524   :  { %v3889_v37 = vpop.f32.mrb[107].mxu0 }
 0x525   :  { %v1892_v38 = vadd.f32 %v3887_v34, %v1891_v29  ;;  %v1930_v39 = vmul.f32 %v3887_v34, %v3887_v34  ;;  %v3890_v40 = vadd.f32 %v3889_v37, %v3888_v35 }
 0x527   :  { %v1961_v41 = vadd.f32 %v1960_v31, %v1930_v39  ;;  %v1893_v42 = vadd.f32 %v3890_v40, %v1892_v38  ;;  %v1931_v43 = vmul.f32 %v3890_v40, %v3890_v40 }
 0x529   :  { %v1962_v44 = vadd.f32 %v1961_v41, %v1931_v43  ;;  %v3891_v45 = vpop.f32.mrb[108].mxu0 }
 0x52a   :  { %v3892_v46 = vpop.f32.mrb[109].mxu0 }
 0x52b   :  { %v3893_v47 = vadd.f32 %v3892_v46, %v3891_v45  ;;  %v3894_v48 = vpop.f32.mrb[110].mxu0 }
 0x52c   :  { %v3895_v49 = vpop.f32.mrb[111].mxu0 }
 0x52d   :  { %v1894_v50 = vadd.f32 %v3893_v47, %v1893_v42  ;;  %v1932_v51 = vmul.f32 %v3893_v47, %v3893_v47  ;;  %v3896_v52 = vadd.f32 %v3895_v49, %v3894_v48 }
 0x52f   :  { %v1963_v53 = vadd.f32 %v1962_v44, %v1932_v51  ;;  %v1895_v54 = vadd.f32 %v3896_v52, %v1894_v50  ;;  %v1933_v55 = vmul.f32 %v3896_v52, %v3896_v52 }
 0x531   :  { %v1964_v56 = vadd.f32 %v1963_v53, %v1933_v55  ;;  %v3897_v57 = vpop.f32.mrb[112].mxu0 }
 0x532   :  { %v3898_v58 = vpop.f32.mrb[113].mxu0 }
 0x533   :  { %v3899_v24 = vadd.f32 %v3898_v58, %v3897_v57  ;;  %v3900_v12 = vpop.f32.mrb[114].mxu0 }
 0x534   :  { %v3901_v0 = vpop.f32.mrb[115].mxu0 }
 0x535   :  { %v1896_v21 = vadd.f32 %v3899_v24, %v1895_v54  ;;  %v1934_v62 = vmul.f32 %v3899_v24, %v3899_v24  ;;  %v3902_v9 = vadd.f32 %v3901_v0, %v3900_v12 }
 0x537   :  { %v1965_v20 = vadd.f32 %v1964_v56, %v1934_v62  ;;  %v1897_v22 = vadd.f32 %v3902_v9, %v1896_v21  ;;  %v1935_v23 = vmul.f32 %v3902_v9, %v3902_v9 }
 0x539   :  { %v1966_v25 = vadd.f32 %v1965_v20, %v1935_v23  ;;  %v3903_v26 = vpop.f32.mrb[116].mxu0  ;;  %v3634_v20 = vld [vmem:[%s5221_s9] ss:$0 sm:$0xff] }
 0x53a   :  { %v3904_v27 = vpop.f32.mrb[117].mxu0 }
 0x53b   :  { %v3905_v28 = vadd.f32 %v3904_v27, %v3903_v26  ;;  %v3906_v59 = vpop.f32.mrb[118].mxu0 }
 0x53c   :  { %v3907_v60 = vpop.f32.mrb[119].mxu0 }
 0x53d   :  { %v1898_v1 = vadd.f32 %v3905_v28, %v1897_v22  ;;  %v1936_v2 = vmul.f32 %v3905_v28, %v3905_v28  ;;  %v3908_v3 = vadd.f32 %v3907_v60, %v3906_v59 }
 0x53f   :  { %v1967_v4 = vadd.f32 %v1966_v25, %v1936_v2  ;;  %v1899_v5 = vadd.f32 %v3908_v3, %v1898_v1  ;;  %v1937_v6 = vmul.f32 %v3908_v3, %v3908_v3  ;;  %v3635_v25 = vld [vmem:[%s5222_s10] ss:$0 sm:$0xff] }
 0x540   :  { %v5055_v3 = vld [vmem:[%s5224_s12] ss:$0 sm:$0xff] }
 0x541   :  { %v1968_v7 = vadd.f32 %v1967_v4, %v1937_v6  ;;  %v3909_v63 = vpop.f32.mrb[120].mxu0 }
 0x542   :  { %v3910_v8 = vpop.f32.mrb[121].mxu0 }
 0x543   :  { %v3911_v14 = vadd.f32 %v3910_v8, %v3909_v63  ;;  %v3912_v13 = vpop.f32.mrb[122].mxu0 }
 0x544   :  { %v3913_v15 = vpop.f32.mrb[123].mxu0 }
 0x545   :  { %v1900_v16 = vadd.f32 %v3911_v14, %v1899_v5  ;;  %v1938_v17 = vmul.f32 %v3911_v14, %v3911_v14  ;;  %v3914_v18 = vadd.f32 %v3913_v15, %v3912_v13 }
 0x547   :  { %v1969_v19 = vadd.f32 %v1968_v7, %v1938_v17  ;;  %v1901_v61 = vadd.f32 %v3914_v18, %v1900_v16  ;;  %v1939_v29 = vmul.f32 %v3914_v18, %v3914_v18 }
 0x549   :  { %v1970_v30 = vadd.f32 %v1969_v19, %v1939_v29  ;;  %v3915_v31 = vpop.f32.mrb[124].mxu0 }
 0x54a   :  { %v3916_v32 = vpop.f32.mrb[125].mxu0 }
 0x54b   :  { %v3917_v11 = vadd.f32 %v3916_v32, %v3915_v31  ;;  %v3918_v34 = vpop.f32.mrb[126].mxu0 }
 0x54c   :  { %v3919_v35 = vpop.f32.mrb[127].mxu0 }
 0x54d   :  { %v1902_v37 = vadd.f32 %v3917_v11, %v1901_v61  ;;  %v1940_v38 = vmul.f32 %v3917_v11, %v3917_v11  ;;  %v3920_v39 = vadd.f32 %v3919_v35, %v3918_v34 }
 0x54f   :  { %v1971_v40 = vadd.f32 %v1970_v30, %v1940_v38  ;;  %v1903_v41 = vadd.f32 %v3920_v39, %v1902_v37  ;;  %v1941_v42 = vmul.f32 %v3920_v39, %v3920_v39 }
 0x551   :  { %v1904_v43 = vrot.slane %v1903_v41, 4  ;;  %v1972_v44 = vadd.f32 %v1971_v40, %v1941_v42 }
 0x553   :  { %v1905_v45 = vadd.f32 %v1904_v43, %v1903_v41  ;;  %v1973_v46 = vrot.slane %v1972_v44, 4 }
 0x555   :  { %v1906_v47 = vrot.slane %v1905_v45, 2  ;;  %v1974_v48 = vadd.f32 %v1973_v46, %v1972_v44 }
 0x557   :  { %v1907_v49 = vadd.f32 %v1906_v47, %v1905_v45  ;;  %v1975_v50 = vrot.slane %v1974_v48, 2 }
 0x559   :  { %v1908_v51 = vrot.slane %v1907_v49, 1  ;;  %v1976_v52 = vadd.f32 %v1975_v50, %v1974_v48 }
 0x55b   :  { %v1909_v53 = vadd.f32 %v1908_v51, %v1907_v49  ;;  %v1977_v54 = vrot.slane %v1976_v52, 1 }
 0x55d   :  { %v1978_v55 = vadd.f32 %v1977_v54, %v1976_v52  ;;  %v1979_v56 = vmul.f32 0.0625, %v1909_v53 }
 0x55e   :  { %v4204_v4 = vpop.f32.mrb[64].mxu1 }
 0x55f   :  { %v1980_v57 = vmul.f32 0.0625, %v1978_v55  ;;  %v1981_v58 = vmul.f32 %v1979_v56, %v1979_v56  ;;  %v1984_v21 = vsub.f32 %v5004_v33, %v1979_v56  ;;  %v1985_v62 = vsub.f32 %v5006_v36, %v1979_v56  ;;  %v2441_v5 = vpop.f32.mrb[65].mxu1 }
 0x560   :  { %v2450_v6 = vadd.f32 %v4204_v4, %v5055_v3  ;;  %v4205_v7 = vpop.f32.mrb[66].mxu1  ;;  %v2442_v8 = vadd.f32 %v5055_v3, %v2441_v5 }
 0x561   :  { %v1982_v24 = vsub.f32 %v1980_v57, %v1981_v58  ;;  %v2444_v63 = vpop.f32.mrb[67].mxu1  ;;  %v2453_v14 = vadd.f32 %v4205_v7, %v5055_v3 }
 0x562   :  { %v2445_v13 = vadd.f32 %v5055_v3, %v2444_v63 }
 0x563   :  { %v1983_v12 = vmax.f32 %v1982_v24, 0.0  ;;  %v2513_v15 = vpack.c.bf16 %v2453_v14, %v2450_v6 }
 0x564   :  { %v2512_v16 = vpack.c.bf16 %v2445_v13, %v2442_v8 }
 0x565   :  { %v2016_v0 = vadd.f32 1e-05, %v1983_v12 }
 0x566   :  { %v4208_v17 = vpop.f32.mrb[68].mxu1  ;;  %3945 = vmatprep.subr.bf16.mxu1 %v2512_v16 }
 0x567   :  { %4340 = vrsqrt.f32 %v2016_v0  ;;  %v2457_v18 = vpop.f32.mrb[69].mxu1  ;;  %v2466_v19 = vadd.f32 %v4208_v17, %v5055_v3 }
 0x568   :  { %v4209_v61 = vpop.f32.mrb[70].mxu1  ;;  %v2458_v30 = vadd.f32 %v5055_v3, %v2457_v18 }
 0x569   :  { %v2460_v29 = vpop.f32.mrb[71].mxu1  ;;  %v2469_v31 = vadd.f32 %v4209_v61, %v5055_v3 }
 0x56a   :  { %v2461_v32 = vadd.f32 %v5055_v3, %v2460_v29 }
 0x56b   :  { %v2515_v11 = vpack.c.bf16 %v2469_v31, %v2466_v19 }
 0x56c   :  { %v2514_v34 = vpack.c.bf16 %v2461_v32, %v2458_v30 }
 0x56e   :  { %v4212_v35 = vpop.f32.mrb[72].mxu1 }
 0x56f   :  { %v2473_v37 = vpop.f32.mrb[73].mxu1  ;;  %v2482_v38 = vadd.f32 %v4212_v35, %v5055_v3  ;;  %v4369_v35 = vld [vmem:[#allocation2 + $0x10] sm:$0xff] }
 0x570   :  { %v4213_v39 = vpop.f32.mrb[74].mxu1  ;;  %v2474_v41 = vadd.f32 %v5055_v3, %v2473_v37  ;;  %v4370_v37 = vld [vmem:[#allocation2 + $0x28] sm:$0xff] }
 0x571   :  { %v4341_v9 = vpop.eup %4340  ;;  %v2476_v40 = vpop.f32.mrb[75].mxu1  ;;  %v2485_v42 = vadd.f32 %v4213_v39, %v5055_v3  ;;  %v4372_v39 = vld [vmem:[#allocation2 + $0x38] sm:$0xff] }
 0x572   :  { %v2018_v22 = vmul.f32 %v4341_v9, %v1984_v21  ;;  %v2019_v23 = vmul.f32 %v4341_v9, %v1985_v62  ;;  %v2477_v43 = vadd.f32 %v5055_v3, %v2476_v40  ;;  %v4374_v40 = vld [vmem:[#allocation2 + $0x48] sm:$0xff] }
 0x573   :  { %v2517_v44 = vpack.c.bf16 %v2485_v42, %v2482_v38  ;;  %v4371_v38 = vld [vmem:[#allocation2 + $0x20] sm:$0xff]  ;;  %v4376_v42 = vld [vmem:[#allocation2 + $0x58] sm:$0xff] }
 0x574   :  { %v2057_v26 = vmul.f32 %v3634_v20, %v2018_v22  ;;  %v2058_v27 = vmul.f32 %v3634_v20, %v2019_v23  ;;  %v2516_v45 = vpack.c.bf16 %v2477_v43, %v2474_v41  ;;  %v4375_v41 = vld [vmem:[#allocation2 + $0x40] sm:$0xff]  ;;  %v4377_v43 = vld [vmem:[#allocation2 + $0x50] sm:$0xff] }
 0x576   :  { %v2096_v28 = vadd.f32 %v3635_v25, %v2057_v26  ;;  %v2097_v59 = vadd.f32 %v3635_v25, %v2058_v27  ;;  %v4216_v46 = vpop.f32.mrb[76].mxu1 }
 0x577   :  { %v2489_v47 = vpop.f32.mrb[77].mxu1  ;;  %v2498_v48 = vadd.f32 %v4216_v46, %v5055_v3  ;;  %v4380_v46 = vld [vmem:[#allocation2 + $0x78] sm:$0xff] }
 0x578   :  { %vm2128_vm2 = vcmp.gt.f32.partialorder %v2096_v28, 0.0  ;;  %vm2129_vm3 = vcmp.gt.f32.partialorder %v2097_v59, 0.0  ;;  %v2160_v33 = vmul.f32 0.1, %v2096_v28  ;;  %v2161_v60 = vmul.f32 0.1, %v2097_v59 }
 0x579   :  { %v4217_v49 = vpop.f32.mrb[78].mxu1  ;;  %v2490_v51 = vadd.f32 %v5055_v3, %v2489_v47  ;;  %v4381_v47 = vld [vmem:[#allocation2 + $0x70] sm:$0xff] }
 0x57a   :  { %v2192_v36 = vsel %vm2128_vm2, %v2096_v28, %v2160_v33  ;;  %v2193_v1 = vsel %vm2129_vm3, %v2097_v59, %v2161_v60  ;;  %v2492_v50 = vpop.f32.mrb[79].mxu1  ;;  %v2501_v52 = vadd.f32 %v4217_v49, %v5055_v3  ;;  %v4383_v49 = vld [vmem:[#allocation2 + $0x80] sm:$0xff] }
 0x57b   :  { %v2256_v2 = vpack.c.bf16 %v2193_v1, %v2192_v36  ;;  %v2493_v53 = vadd.f32 %v5055_v3, %v2492_v50  ;;  %v4384_v50 = vld [vmem:[#allocation2 + $0x98] sm:$0xff] }
 0x57c   :  { %v2519_v54 = vpack.c.bf16 %v2501_v52, %v2498_v48  ;;  %v4382_v48 = vld [vmem:[#allocation2 + $0x88] sm:$0xff] }
 0x57d   :  { %4186 = vmatprep.mubr.bf16.mxu0 %v2256_v2  ;;  %v2518_v55 = vpack.c.bf16 %v2493_v53, %v2490_v51  ;;  %v4385_v51 = vld [vmem:[#allocation2 + $0x90] sm:$0xff]  ;;  %v4386_v52 = vld [vmem:[#allocation2 + $0xa8] sm:$0xff]  ;;  %v4387_v53 = vld [vmem:[#allocation2 + $0xa0] sm:$0xff] }
 0x57e   :  { %4187 = vmatmul.mubr.bf16.vlgmr.msra.gmra.mrb[128].mxu0 %v4400_v10 }
 0x57f   :  { %4190 = vmatprep.mubr.bf16.mxu0 %v4400_v10 }
 0x586   :  { %4191 = vmatmul.mubr.bf16.gmra.mrb[132].mxu0 %v4400_v10 }
 0x587   :  { %4194 = vmatprep.mubr.bf16.mxu0 %v4400_v10 }
 0x58e   :  { %4195 = vmatmul.mubr.bf16.gmra.mrb[136].mxu0 %v4400_v10 }
 0x58f   :  { %4198 = vmatprep.mubr.bf16.mxu0 %v4400_v10 }
 0x596   :  { %4199 = vmatmul.mubr.bf16.gmra.mrb[140].mxu0 %v4400_v10 }
 0x651   :  { %v4188_v56 = vpop.f32.mrb[128].mxu0 }
 0x652   :  { %v2377_v57 = vpop.f32.mrb[129].mxu0  ;;  %v2386_v24 = vadd.f32 %v4188_v56, %v5055_v3  ;;  %v4390_v56 = vld [vmem:[#allocation2 + $0xc8] sm:$0xff] }
 0x653   :  { %v4189_v58 = vpop.f32.mrb[130].mxu0  ;;  %v2378_v21 = vadd.f32 %v5055_v3, %v2377_v57  ;;  %v4391_v57 = vld [vmem:[#allocation2 + $0xc0] sm:$0xff] }
 0x654   :  { %v2389_v12 = vadd.f32 %v4189_v58, %v5055_v3  ;;  %v2380_v0 = vpop.f32.mrb[131].mxu0  ;;  %v4392_v58 = vld [vmem:[#allocation2 + $0xd8] sm:$0xff] }
 0x655   :  { %v2381_v62 = vadd.f32 %v5055_v3, %v2380_v0  ;;  %v4395_v0 = vld [vmem:[#allocation2 + $0xe0] sm:$0xff] }
 0x656   :  { %v2505_v9 = vpack.c.bf16 %v2389_v12, %v2386_v24  ;;  %v4393_v24 = vld [vmem:[#allocation2 + $0xd0] sm:$0xff]  ;;  %v4394_v12 = vld [vmem:[#allocation2 + $0xe8] sm:$0xff] }
 0x657   :  { %v2504_v20 = vpack.c.bf16 %v2381_v62, %v2378_v21  ;;  %v4396_v21 = vld [vmem:[#allocation2 + $0xf8] sm:$0xff]  ;;  %v4397_v62 = vld [vmem:[#allocation2 + $0xf0] sm:$0xff] }
 0x659   :  { %v4192_v22 = vpop.f32.mrb[132].mxu0  ;;  %3946 = vmatpush3.bf16.msra.mxu1 %v2504_v20 }
 0x65a   :  { %v2393_v23 = vpop.f32.mrb[133].mxu0  ;;  %3947 = vmatprep.subr.bf16.mxu1 %v2513_v15  ;;  %v2402_v26 = vadd.f32 %v4192_v22, %v5055_v3 }
 0x65b   :  { %v4193_v25 = vpop.f32.mrb[134].mxu0  ;;  %v2394_v59 = vadd.f32 %v5055_v3, %v2393_v23 }
 0x65c   :  { %v2405_v27 = vadd.f32 %v4193_v25, %v5055_v3  ;;  %v2396_v28 = vpop.f32.mrb[135].mxu0 }
 0x65d   :  { %v2397_v33 = vadd.f32 %v5055_v3, %v2396_v28  ;;  %3948 = vmatpush3.bf16.msra.mxu1 %v2505_v9 }
 0x65e   :  { %v2507_v60 = vpack.c.bf16 %v2405_v27, %v2402_v26  ;;  %3949 = vmatprep.subr.bf16.mxu1 %v2514_v34  ;;  %v4368_v34 = vld [vmem:[#allocation2 + $0x18] sm:$0xff] }
 0x65f   :  { %v2506_v36 = vpack.c.bf16 %v2397_v33, %v2394_v59 }
 0x661   :  { %v4196_v1 = vpop.f32.mrb[136].mxu0  ;;  %3950 = vmatpush3.bf16.msra.mxu1 %v2506_v36 }
 0x662   :  { %v2409_v2 = vpop.f32.mrb[137].mxu0  ;;  %3951 = vmatprep.subr.bf16.mxu1 %v2515_v11  ;;  %v2418_v5 = vadd.f32 %v4196_v1, %v5055_v3  ;;  %v4367_v11 = vld [vmem:[#allocation2] sm:$0xff] }
 0x663   :  { %v4197_v4 = vpop.f32.mrb[138].mxu0  ;;  %v2410_v63 = vadd.f32 %v5055_v3, %v2409_v2 }
 0x664   :  { %v2421_v6 = vadd.f32 %v4197_v4, %v5055_v3  ;;  %v2412_v7 = vpop.f32.mrb[139].mxu0 }
 0x665   :  { %v2413_v8 = vadd.f32 %v5055_v3, %v2412_v7  ;;  %3952 = vmatpush3.bf16.msra.mxu1 %v2507_v60 }
 0x666   :  { %v2509_v14 = vpack.c.bf16 %v2421_v6, %v2418_v5  ;;  %3953 = vmatprep.subr.bf16.mxu1 %v2516_v45  ;;  %v4379_v45 = vld [vmem:[#allocation2 + $0x60] sm:$0xff] }
 0x667   :  { %v2508_v13 = vpack.c.bf16 %v2413_v8, %v2410_v63 }
 0x669   :  { %v4200_v15 = vpop.f32.mrb[140].mxu0  ;;  %3954 = vmatpush3.bf16.msra.mxu1 %v2508_v13 }
 0x66a   :  { %v2425_v16 = vpop.f32.mrb[141].mxu0  ;;  %3955 = vmatprep.subr.bf16.mxu1 %v2517_v44  ;;  %v2434_v18 = vadd.f32 %v4200_v15, %v5055_v3  ;;  %v4378_v44 = vld [vmem:[#allocation2 + $0x68] sm:$0xff] }
 0x66b   :  { %v4201_v17 = vpop.f32.mrb[142].mxu0  ;;  %v2426_v29 = vadd.f32 %v5055_v3, %v2425_v16 }
 0x66c   :  { %v2437_v19 = vadd.f32 %v4201_v17, %v5055_v3  ;;  %v2428_v61 = vpop.f32.mrb[143].mxu0 }
 0x66d   :  { %v2429_v30 = vadd.f32 %v5055_v3, %v2428_v61  ;;  %3956 = vmatpush3.bf16.msra.mxu1 %v2509_v14  ;;  %v4373_v3 = vld [vmem:[#allocation2 + $0x30] sm:$0xff] }
 0x66e   :  { %v2511_v31 = vpack.c.bf16 %v2437_v19, %v2434_v18  ;;  %3957 = vmatprep.subr.bf16.mxu1 %v2518_v55  ;;  %v4389_v55 = vld [vmem:[#allocation2 + $0xb0] sm:$0xff] }
 0x66f   :  { %v2510_v32 = vpack.c.bf16 %v2429_v30, %v2426_v29 }
 0x671   :  { %3958 = vmatpush3.bf16.msra.mxu1 %v2510_v32 }
 0x672   :  { %3959 = vmatprep.subr.bf16.mxu1 %v2519_v54  ;;  %v4388_v54 = vld [vmem:[#allocation2 + $0xb8] sm:$0xff] }
 0x675   :  { %3960 = vmatpush3.bf16.msra.mxu1 %v2511_v31 }
 0x678   :  { %2553 = vmatmul.mubr.bf16.vlgmr.msra.gmra.mrb[80].mxu1 %v4367_v11 }
 0x679   :  { %2560 = vmatprep.mubr.bf16.mxu1 %v4368_v34 }
 0x680   :  { %2561 = vmatmul.mubr.bf16.gmra.mrb[84].mxu1 %v4369_v35 }
 0x681   :  { %2568 = vmatprep.mubr.bf16.mxu1 %v4370_v37 }
 0x688   :  { %2569 = vmatmul.mubr.bf16.gmra.mrb[88].mxu1 %v4371_v38 }
 0x689   :  { %2576 = vmatprep.mubr.bf16.mxu1 %v4372_v39 }
 0x690   :  { %2577 = vmatmul.mubr.bf16.gmra.mrb[92].mxu1 %v4373_v3 }
 0x691   :  { %2584 = vmatprep.mubr.bf16.mxu1 %v4374_v40 }
 0x698   :  { %2585 = vmatmul.mubr.bf16.gmra.mrb[96].mxu1 %v4375_v41 }
 0x699   :  { %2592 = vmatprep.mubr.bf16.mxu1 %v4376_v42 }
 0x6a0   :  { %2593 = vmatmul.mubr.bf16.gmra.mrb[100].mxu1 %v4377_v43 }
 0x6a1   :  { %2600 = vmatprep.mubr.bf16.mxu1 %v4378_v44 }
 0x6a8   :  { %2601 = vmatmul.mubr.bf16.gmra.mrb[104].mxu1 %v4379_v45 }
 0x6a9   :  { %2608 = vmatprep.mubr.bf16.mxu1 %v4380_v46 }
 0x6b0   :  { %2609 = vmatmul.mubr.bf16.gmra.mrb[108].mxu1 %v4381_v47 }
 0x6b1   :  { %2616 = vmatprep.mubr.bf16.mxu1 %v4382_v48 }
 0x6b8   :  { %2617 = vmatmul.mubr.bf16.gmra.mrb[112].mxu1 %v4383_v49 }
 0x6b9   :  { %2624 = vmatprep.mubr.bf16.mxu1 %v4384_v50 }
 0x6c0   :  { %2625 = vmatmul.mubr.bf16.gmra.mrb[116].mxu1 %v4385_v51 }
 0x6c1   :  { %2632 = vmatprep.mubr.bf16.mxu1 %v4386_v52 }
 0x6c8   :  { %2633 = vmatmul.mubr.bf16.gmra.mrb[120].mxu1 %v4387_v53 }
 0x6c9   :  { %2640 = vmatprep.mubr.bf16.mxu1 %v4388_v54 }
 0x6d0   :  { %2641 = vmatmul.mubr.bf16.gmra.mrb[124].mxu1 %v4389_v55 }
 0x6d1   :  { %2648 = vmatprep.mubr.bf16.mxu1 %v4390_v56 }
 0x6d8   :  { %2649 = vmatmul.mubr.bf16.gmra.mrb[128].mxu1 %v4391_v57 }
 0x6d9   :  { %2656 = vmatprep.mubr.bf16.mxu1 %v4392_v58 }
 0x6e0   :  { %2657 = vmatmul.mubr.bf16.gmra.mrb[132].mxu1 %v4393_v24 }
 0x6e1   :  { %2664 = vmatprep.mubr.bf16.mxu1 %v4394_v12 }
 0x6e8   :  { %2665 = vmatmul.mubr.bf16.gmra.mrb[136].mxu1 %v4395_v0 }
 0x6e9   :  { %2672 = vmatprep.mubr.bf16.mxu1 %v4396_v21 }
 0x6f0   :  { %2673 = vmatmul.mubr.bf16.gmra.mrb[140].mxu1 %v4397_v62 }
 0x74b   :  { %v3961_v9 = vpop.f32.mrb[80].mxu1 }
 0x74c   :  { %v3962_v20 = vpop.f32.mrb[81].mxu1 }
 0x74d   :  { %v5089_v22 = vadd.f32 %v3962_v20, %v3961_v9  ;;  %v3964_v23 = vpop.f32.mrb[82].mxu1 }
 0x74e   :  { %v3965_v25 = vpop.f32.mrb[83].mxu1 }
 0x74f   :  { %v5091_v26 = vadd.f32 %v3965_v25, %v3964_v23  ;;  %v2718_v33 = vmul.f32 %v5089_v22, %v5089_v22 }
 0x751   :  { %v2719_v27 = vmul.f32 %v5091_v26, %v5091_v26  ;;  %v2681_v60 = vadd.f32 %v5091_v26, %v5089_v22 }
 0x753   :  { %v3967_v28 = vpop.f32.mrb[84].mxu1  ;;  %v2750_v4 = vadd.f32 %v2719_v27, %v2718_v33 }
 0x754   :  { %v3968_v59 = vpop.f32.mrb[85].mxu1 }
 0x755   :  { %v3969_v36 = vadd.f32 %v3968_v59, %v3967_v28  ;;  %v3970_v1 = vpop.f32.mrb[86].mxu1 }
 0x756   :  { %v3971_v2 = vpop.f32.mrb[87].mxu1 }
 0x757   :  { %v2682_v5 = vadd.f32 %v3969_v36, %v2681_v60  ;;  %v2720_v6 = vmul.f32 %v3969_v36, %v3969_v36  ;;  %v3972_v7 = vadd.f32 %v3971_v2, %v3970_v1 }
 0x759   :  { %v2751_v63 = vadd.f32 %v2750_v4, %v2720_v6  ;;  %v2683_v8 = vadd.f32 %v3972_v7, %v2682_v5  ;;  %v2721_v14 = vmul.f32 %v3972_v7, %v3972_v7 }
 0x75b   :  { %v2752_v13 = vadd.f32 %v2751_v63, %v2721_v14  ;;  %v3973_v15 = vpop.f32.mrb[88].mxu1 }
 0x75c   :  { %v3974_v16 = vpop.f32.mrb[89].mxu1 }
 0x75d   :  { %v3975_v17 = vadd.f32 %v3974_v16, %v3973_v15  ;;  %v3976_v18 = vpop.f32.mrb[90].mxu1 }
 0x75e   :  { %v3977_v19 = vpop.f32.mrb[91].mxu1 }
 0x75f   :  { %v2684_v61 = vadd.f32 %v3975_v17, %v2683_v8  ;;  %v2722_v29 = vmul.f32 %v3975_v17, %v3975_v17  ;;  %v3978_v30 = vadd.f32 %v3977_v19, %v3976_v18 }
 0x761   :  { %v2753_v31 = vadd.f32 %v2752_v13, %v2722_v29  ;;  %v2685_v32 = vadd.f32 %v3978_v30, %v2684_v61  ;;  %v2723_v11 = vmul.f32 %v3978_v30, %v3978_v30 }
 0x763   :  { %v2754_v34 = vadd.f32 %v2753_v31, %v2723_v11  ;;  %v3979_v35 = vpop.f32.mrb[92].mxu1 }
 0x764   :  { %v3980_v37 = vpop.f32.mrb[93].mxu1 }
 0x765   :  { %v3981_v38 = vadd.f32 %v3980_v37, %v3979_v35  ;;  %v3982_v39 = vpop.f32.mrb[94].mxu1 }
 0x766   :  { %v3983_v3 = vpop.f32.mrb[95].mxu1 }
 0x767   :  { %v2686_v40 = vadd.f32 %v3981_v38, %v2685_v32  ;;  %v2724_v41 = vmul.f32 %v3981_v38, %v3981_v38  ;;  %v3984_v42 = vadd.f32 %v3983_v3, %v3982_v39 }
 0x769   :  { %v2755_v43 = vadd.f32 %v2754_v34, %v2724_v41  ;;  %v2687_v44 = vadd.f32 %v3984_v42, %v2686_v40  ;;  %v2725_v45 = vmul.f32 %v3984_v42, %v3984_v42 }
 0x76b   :  { %v2756_v46 = vadd.f32 %v2755_v43, %v2725_v45  ;;  %v3985_v47 = vpop.f32.mrb[96].mxu1 }
 0x76c   :  { %v3986_v48 = vpop.f32.mrb[97].mxu1 }
 0x76d   :  { %v3987_v49 = vadd.f32 %v3986_v48, %v3985_v47  ;;  %v3988_v50 = vpop.f32.mrb[98].mxu1 }
 0x76e   :  { %v3989_v51 = vpop.f32.mrb[99].mxu1 }
 0x76f   :  { %v2688_v52 = vadd.f32 %v3987_v49, %v2687_v44  ;;  %v2726_v53 = vmul.f32 %v3987_v49, %v3987_v49  ;;  %v3990_v54 = vadd.f32 %v3989_v51, %v3988_v50 }
 0x771   :  { %v2757_v55 = vadd.f32 %v2756_v46, %v2726_v53  ;;  %v2689_v56 = vadd.f32 %v3990_v54, %v2688_v52  ;;  %v2727_v57 = vmul.f32 %v3990_v54, %v3990_v54 }
 0x773   :  { %v2758_v58 = vadd.f32 %v2757_v55, %v2727_v57  ;;  %v3991_v24 = vpop.f32.mrb[100].mxu1 }
 0x774   :  { %v3992_v12 = vpop.f32.mrb[101].mxu1 }
 0x775   :  { %v3993_v0 = vadd.f32 %v3992_v12, %v3991_v24  ;;  %v3994_v21 = vpop.f32.mrb[102].mxu1 }
 0x776   :  { %v3995_v62 = vpop.f32.mrb[103].mxu1 }
 0x777   :  { %v2690_v9 = vadd.f32 %v3993_v0, %v2689_v56  ;;  %v2728_v20 = vmul.f32 %v3993_v0, %v3993_v0  ;;  %v3996_v23 = vadd.f32 %v3995_v62, %v3994_v21 }
 0x779   :  { %v2759_v25 = vadd.f32 %v2758_v58, %v2728_v20  ;;  %v2691_v27 = vadd.f32 %v3996_v23, %v2690_v9  ;;  %v2729_v28 = vmul.f32 %v3996_v23, %v3996_v23 }
 0x77b   :  { %v2760_v59 = vadd.f32 %v2759_v25, %v2729_v28  ;;  %v3997_v33 = vpop.f32.mrb[104].mxu1 }
 0x77c   :  { %v3998_v60 = vpop.f32.mrb[105].mxu1 }
 0x77d   :  { %v3999_v36 = vadd.f32 %v3998_v60, %v3997_v33  ;;  %v4000_v1 = vpop.f32.mrb[106].mxu1 }
 0x77e   :  { %v4001_v2 = vpop.f32.mrb[107].mxu1 }
 0x77f   :  { %v2692_v4 = vadd.f32 %v3999_v36, %v2691_v27  ;;  %v2730_v5 = vmul.f32 %v3999_v36, %v3999_v36  ;;  %v4002_v6 = vadd.f32 %v4001_v2, %v4000_v1 }
 0x781   :  { %v2761_v7 = vadd.f32 %v2760_v59, %v2730_v5  ;;  %v2693_v63 = vadd.f32 %v4002_v6, %v2692_v4  ;;  %v2731_v8 = vmul.f32 %v4002_v6, %v4002_v6 }
 0x783   :  { %v2762_v14 = vadd.f32 %v2761_v7, %v2731_v8  ;;  %v4003_v13 = vpop.f32.mrb[108].mxu1 }
 0x784   :  { %v4004_v15 = vpop.f32.mrb[109].mxu1 }
 0x785   :  { %v4005_v16 = vadd.f32 %v4004_v15, %v4003_v13  ;;  %v4006_v17 = vpop.f32.mrb[110].mxu1 }
 0x786   :  { %v4007_v18 = vpop.f32.mrb[111].mxu1 }
 0x787   :  { %v2694_v19 = vadd.f32 %v4005_v16, %v2693_v63  ;;  %v2732_v61 = vmul.f32 %v4005_v16, %v4005_v16  ;;  %v4008_v29 = vadd.f32 %v4007_v18, %v4006_v17 }
 0x789   :  { %v2763_v30 = vadd.f32 %v2762_v14, %v2732_v61  ;;  %v2695_v31 = vadd.f32 %v4008_v29, %v2694_v19  ;;  %v2733_v32 = vmul.f32 %v4008_v29, %v4008_v29 }
 0x78b   :  { %v2764_v11 = vadd.f32 %v2763_v30, %v2733_v32  ;;  %v4009_v34 = vpop.f32.mrb[112].mxu1 }
 0x78c   :  { %v4010_v35 = vpop.f32.mrb[113].mxu1 }
 0x78d   :  { %v4011_v37 = vadd.f32 %v4010_v35, %v4009_v34  ;;  %v4012_v38 = vpop.f32.mrb[114].mxu1 }
 0x78e   :  { %v4013_v39 = vpop.f32.mrb[115].mxu1 }
 0x78f   :  { %v2696_v3 = vadd.f32 %v4011_v37, %v2695_v31  ;;  %v2734_v40 = vmul.f32 %v4011_v37, %v4011_v37  ;;  %v4014_v41 = vadd.f32 %v4013_v39, %v4012_v38  ;;  %v5102_v39 = vstv %s5229_s17 }
 0x790   :  { %4342 = vrcp.f32 %v5102_v39 }
 0x791   :  { %v2765_v42 = vadd.f32 %v2764_v11, %v2734_v40  ;;  %v2697_v43 = vadd.f32 %v4014_v41, %v2696_v3  ;;  %v2735_v44 = vmul.f32 %v4014_v41, %v4014_v41 }
 0x793   :  { %v2766_v45 = vadd.f32 %v2765_v42, %v2735_v44  ;;  %v4015_v46 = vpop.f32.mrb[116].mxu1  ;;  %v3486_v42 = vld [vmem:[%s5227_s15] sm:$0xff]  ;;  %v3488_v44 = vld [vmem:[%s5227_s15 + $0x10] sm:$0xff] }
 0x794   :  { %v4016_v47 = vpop.f32.mrb[117].mxu1 }
 0x795   :  { %v4017_v48 = vadd.f32 %v4016_v47, %v4015_v46  ;;  %v4018_v49 = vpop.f32.mrb[118].mxu1  ;;  %v3489_v46 = vld [vmem:[%s5227_s15 + $0x18] sm:$0xff] }
 0x796   :  { %v4019_v50 = vpop.f32.mrb[119].mxu1 }
 0x797   :  { %v2698_v51 = vadd.f32 %v4017_v48, %v2697_v43  ;;  %v2736_v52 = vmul.f32 %v4017_v48, %v4017_v48  ;;  %v4020_v53 = vadd.f32 %v4019_v50, %v4018_v49  ;;  %v3487_v43 = vld [vmem:[%s5227_s15 + $0x8] sm:$0xff]  ;;  %v4257_v50 = vpack.c.bf16 %v3489_v46, %v3488_v44 }
 0x799   :  { %v2767_v54 = vadd.f32 %v2766_v45, %v2736_v52  ;;  %v2699_v55 = vadd.f32 %v4020_v53, %v2698_v51  ;;  %v2737_v56 = vmul.f32 %v4020_v53, %v4020_v53  ;;  %v4254_v45 = vpack.c.bf16 %v3487_v43, %v3486_v42  ;;  %v3490_v53 = vld [vmem:[%s5227_s15 + $0x20] sm:$0xff] }
 0x79a   :  { %v3084_v42 = vunpack.c.h.bf16 %v4400_v10 }
 0x79b   :  { %v2768_v57 = vadd.f32 %v2767_v54, %v2737_v56  ;;  %v4021_v58 = vpop.f32.mrb[120].mxu1  ;;  %4255 = vmatpush3.bf16.msra.mxu0 %v4254_v45  ;;  %v3491_v54 = vld [vmem:[%s5227_s15 + $0x28] sm:$0xff] }
 0x79c   :  { %v4022_v24 = vpop.f32.mrb[121].mxu1  ;;  %4256 = vmatprep.subr.bf16.mxu0 %v4400_v10  ;;  %v3116_v44 = vmax.f32 %v3084_v42, 0.0 }
 0x79d   :  { %v4023_v12 = vadd.f32 %v4022_v24, %v4021_v58  ;;  %v4024_v0 = vpop.f32.mrb[122].mxu1  ;;  %v4260_v24 = vpack.c.bf16 %v3491_v54, %v3490_v53  ;;  %v3646_v53 = vld [vmem:[%s5226_s14] ss:$0 sm:$0xff] }
 0x79e   :  { %v4025_v21 = vpop.f32.mrb[123].mxu1 }
 0x79f   :  { %v2700_v62 = vadd.f32 %v4023_v12, %v2699_v55  ;;  %v2738_v9 = vmul.f32 %v4023_v12, %v4023_v12  ;;  %v4026_v20 = vadd.f32 %v4025_v21, %v4024_v0  ;;  %4258 = vmatpush3.bf16.msra.mxu0 %v4257_v50 }
 0x7a0   :  { %4259 = vmatprep.subr.bf16.mxu0 %v4400_v10 }
 0x7a1   :  { %v2769_v23 = vadd.f32 %v2768_v57, %v2738_v9  ;;  %v2701_v25 = vadd.f32 %v4026_v20, %v2700_v62  ;;  %v2739_v27 = vmul.f32 %v4026_v20, %v4026_v20  ;;  %v3492_v62 = vld [vmem:[%s5227_s15 + $0x30] sm:$0xff]  ;;  %v3493_v9 = vld [vmem:[%s5227_s15 + $0x38] sm:$0xff]  ;;  %v4343_v20 = vpop.eup %4342 }
 0x7a2   :  { %4293 = vpush %v4343_v20 }
 0x7a3   :  { %v2770_v28 = vadd.f32 %v2769_v23, %v2739_v27  ;;  %v4027_v59 = vpop.f32.mrb[124].mxu1  ;;  %4261 = vmatpush3.bf16.msra.mxu0 %v4260_v24 }
 0x7a4   :  { %v4028_v33 = vpop.f32.mrb[125].mxu1  ;;  %4262 = vmatprep.subr.bf16.mxu0 %v4400_v10 }
 0x7a5   :  { %v4029_v60 = vadd.f32 %v4028_v33, %v4027_v59  ;;  %v4030_v36 = vpop.f32.mrb[126].mxu1 }
 0x7a6   :  { %v4031_v1 = vpop.f32.mrb[127].mxu1 }
 0x7a7   :  { %v2702_v2 = vadd.f32 %v4029_v60, %v2701_v25  ;;  %v2740_v4 = vmul.f32 %v4029_v60, %v4029_v60  ;;  %v4032_v5 = vadd.f32 %v4031_v1, %v4030_v36 }
 0x7a9   :  { %v2771_v6 = vadd.f32 %v2770_v28, %v2740_v4  ;;  %v2703_v7 = vadd.f32 %v4032_v5, %v2702_v2  ;;  %v2741_v63 = vmul.f32 %v4032_v5, %v4032_v5  ;;  %v4263_v28 = vpack.c.bf16 %v3493_v9, %v3492_v62 }
 0x7ab   :  { %v2772_v8 = vadd.f32 %v2771_v6, %v2741_v63  ;;  %v4033_v14 = vpop.f32.mrb[128].mxu1  ;;  %4264 = vmatpush3.bf16.msra.mxu0 %v4263_v28 }
 0x7ac   :  { %v4034_v13 = vpop.f32.mrb[129].mxu1  ;;  %4265 = vmatprep.subr.bf16.mxu0 %v4400_v10 }
 0x7ad   :  { %v4035_v15 = vadd.f32 %v4034_v13, %v4033_v14  ;;  %v4036_v16 = vpop.f32.mrb[130].mxu1 }
 0x7ae   :  { %v4037_v17 = vpop.f32.mrb[131].mxu1 }
 0x7af   :  { %v2704_v18 = vadd.f32 %v4035_v15, %v2703_v7  ;;  %v2742_v19 = vmul.f32 %v4035_v15, %v4035_v15  ;;  %v4038_v61 = vadd.f32 %v4037_v17, %v4036_v16 }
 0x7b1   :  { %v2773_v29 = vadd.f32 %v2772_v8, %v2742_v19  ;;  %v2705_v30 = vadd.f32 %v4038_v61, %v2704_v18  ;;  %v2743_v31 = vmul.f32 %v4038_v61, %v4038_v61 }
 0x7b3   :  { %v2774_v32 = vadd.f32 %v2773_v29, %v2743_v31  ;;  %v4039_v11 = vpop.f32.mrb[132].mxu1 }
 0x7b4   :  { %v4040_v34 = vpop.f32.mrb[133].mxu1 }
 0x7b5   :  { %v4041_v35 = vadd.f32 %v4040_v34, %v4039_v11  ;;  %v4042_v37 = vpop.f32.mrb[134].mxu1 }
 0x7b6   :  { %v4043_v38 = vpop.f32.mrb[135].mxu1 }
 0x7b7   :  { %v2706_v3 = vadd.f32 %v4041_v35, %v2705_v30  ;;  %v2744_v40 = vmul.f32 %v4041_v35, %v4041_v35  ;;  %v4044_v41 = vadd.f32 %v4043_v38, %v4042_v37 }
 0x7b9   :  { %v2775_v47 = vadd.f32 %v2774_v32, %v2744_v40  ;;  %v2707_v48 = vadd.f32 %v4044_v41, %v2706_v3  ;;  %v2745_v49 = vmul.f32 %v4044_v41, %v4044_v41  ;;  %v3083_v41 = vunpack.c.l.bf16 %v4400_v10 }
 0x7bb   :  { %v2776_v51 = vadd.f32 %v2775_v47, %v2745_v49  ;;  %v4045_v52 = vpop.f32.mrb[136].mxu1  ;;  %v3115_v43 = vmax.f32 %v3083_v41, 0.0  ;;  %v3645_v49 = vld [vmem:[%s5225_s13] ss:$0 sm:$0xff] }
 0x7bc   :  { %v4046_v55 = vpop.f32.mrb[137].mxu1 }
 0x7bd   :  { %v4047_v56 = vadd.f32 %v4046_v55, %v4045_v52  ;;  %v4048_v57 = vpop.f32.mrb[138].mxu1  ;;  %v5137_v47 = vmin.f32 %v3115_v43, 100.0  ;;  %v5142_v52 = vmin.f32 %v3116_v44, 100.0 }
 0x7be   :  { %v4049_v58 = vpop.f32.mrb[139].mxu1 }
 0x7bf   :  { %v2708_v12 = vadd.f32 %v4047_v56, %v2707_v48  ;;  %v2746_v0 = vmul.f32 %v4047_v56, %v4047_v56  ;;  %v4050_v21 = vadd.f32 %v4049_v58, %v4048_v57  ;;  %vm3179_vm4 = vcmp.gt.f32.partialorder %v5137_v47, 0.0 }
 0x7c0   :  { %vm3180_vm5 = vcmp.gt.f32.partialorder %v5142_v52, 0.0  ;;  %v3211_v56 = vsel %vm3179_vm4, %v5137_v47, 1.0 }
 0x7c1   :  { %v2777_v23 = vadd.f32 %v2776_v51, %v2746_v0  ;;  %v2709_v25 = vadd.f32 %v4050_v21, %v2708_v12  ;;  %v2747_v27 = vmul.f32 %v4050_v21, %v4050_v21  ;;  %v3212_v24 = vsel %vm3180_vm5, %v5142_v52, 1.0 }
 0x7c3   :  { %v2778_v59 = vadd.f32 %v2777_v23, %v2747_v27  ;;  %v4051_v33 = vpop.f32.mrb[140].mxu1  ;;  %v3495_v27 = vld [vmem:[%s5227_s15 + $0x48] sm:$0xff] }
 0x7c4   :  { %v4052_v60 = vpop.f32.mrb[141].mxu1 }
 0x7c5   :  { %v4053_v36 = vadd.f32 %v4052_v60, %v4051_v33  ;;  %v4054_v1 = vpop.f32.mrb[142].mxu1 }
 0x7c6   :  { %v4055_v2 = vpop.f32.mrb[143].mxu1 }
 0x7c7   :  { %v2710_v4 = vadd.f32 %v4053_v36, %v2709_v25  ;;  %v2748_v5 = vmul.f32 %v4053_v36, %v4053_v36  ;;  %v4056_v6 = vadd.f32 %v4055_v2, %v4054_v1  ;;  %v3494_v25 = vld [vmem:[%s5227_s15 + $0x40] sm:$0xff]  ;;  %v3496_v1 = vld [vmem:[%s5227_s15 + $0x50] sm:$0xff]  ;;  %v3497_v2 = vld [vmem:[%s5227_s15 + $0x58] sm:$0xff] }
 0x7c8   :  { %v4266_v28 = vpack.c.bf16 %v3495_v27, %v3494_v25 }
 0x7c9   :  { %v2779_v7 = vadd.f32 %v2778_v59, %v2748_v5  ;;  %v2711_v63 = vadd.f32 %v4056_v6, %v2710_v4  ;;  %v2749_v8 = vmul.f32 %v4056_v6, %v4056_v6  ;;  %v4269_v6 = vpack.c.bf16 %v3497_v2, %v3496_v1 }
 0x7ca   :  { %4267 = vmatpush3.bf16.msra.mxu0 %v4266_v28 }
 0x7cb   :  { %v2712_v14 = vrot.slane %v2711_v63, 4  ;;  %v2780_v13 = vadd.f32 %v2779_v7, %v2749_v8  ;;  %4268 = vmatprep.subr.bf16.mxu0 %v4400_v10  ;;  %v3498_v8 = vld [vmem:[%s5227_s15 + $0x60] sm:$0xff] }
 0x7cd   :  { %v2713_v15 = vadd.f32 %v2712_v14, %v2711_v63  ;;  %v2781_v16 = vrot.slane %v2780_v13, 4  ;;  %v3499_v14 = vld [vmem:[%s5227_s15 + $0x68] sm:$0xff] }
 0x7ce   :  { %4270 = vmatpush3.bf16.msra.mxu0 %v4269_v6 }
 0x7cf   :  { %v2714_v17 = vrot.slane %v2713_v15, 2  ;;  %v2782_v18 = vadd.f32 %v2781_v16, %v2780_v13  ;;  %4271 = vmatprep.subr.bf16.mxu0 %v4400_v10  ;;  %v4272_v13 = vpack.c.bf16 %v3499_v14, %v3498_v8  ;;  %v3501_v16 = vld [vmem:[%s5227_s15 + $0x78] sm:$0xff] }
 0x7d1   :  { %v2715_v19 = vadd.f32 %v2714_v17, %v2713_v15  ;;  %v2783_v61 = vrot.slane %v2782_v18, 2  ;;  %v3500_v15 = vld [vmem:[%s5227_s15 + $0x70] sm:$0xff]  ;;  %v4402_v17 = vmov 0.0  }
 0x7d2   :  { %4250 = vmatprep.mubr.msk.f32.mxu0 %vm4401_vm10, %v4402_v17  ;;  %4273 = vmatpush3.bf16.msra.mxu0 %v4272_v13 }
 0x7d3   :  { %v2716_v29 = vrot.slane %v2715_v19, 1  ;;  %v2784_v30 = vadd.f32 %v2783_v61, %v2782_v18  ;;  %v4275_v61 = vpack.c.bf16 %v3501_v16, %v3500_v15  ;;  %4274 = vmatprep.subr.bf16.mxu0 %v4400_v10  ;;  %s4294_s15 = spop %4293 }
 0x7d5   :  { %v2717_v31 = vadd.f32 %v2716_v29, %v2715_v19  ;;  %v2785_v32 = vrot.slane %v2784_v30, 1 }
 0x7d6   :  { %4276 = vmatpush3.bf16.msra.mxu0 %v4275_v61 }
 0x7d7   :  { %v2786_v11 = vadd.f32 %v2785_v32, %v2784_v30  ;;  %v2787_v34 = vmul.f32 0.0625, %v2717_v31 }
 0x7d9   :  { %v2788_v35 = vmul.f32 0.0625, %v2786_v11  ;;  %v2789_v37 = vmul.f32 %v2787_v34, %v2787_v34  ;;  %v2792_v45 = vsub.f32 %v5089_v22, %v2787_v34  ;;  %v2793_v46 = vsub.f32 %v5091_v26, %v2787_v34 }
 0x7db   :  { %v2790_v38 = vsub.f32 %v2788_v35, %v2789_v37 }
 0x7dd   :  { %v2791_v3 = vmax.f32 %v2790_v38, 0.0 }
 0x7df   :  { %v2824_v40 = vadd.f32 1e-05, %v2791_v3 }
 0x7e1   :  { %4344 = vrsqrt.f32 %v2824_v40 }
 0x7e2   :  { %4346 = vlog2.f32 %v3211_v56 }
 0x7e3   :  { %4348 = vlog2.f32 %v3212_v24 }
 0x7eb   :  { %v4345_v48 = vpop.eup %4344 }
 0x7ec   :  { %v2826_v50 = vmul.f32 %v4345_v48, %v2792_v45  ;;  %v2827_v51 = vmul.f32 %v4345_v48, %v2793_v46  ;;  %v4347_v7 = vpop.eup %4346 }
 0x7ed   :  { %v4349_v63 = vpop.eup %4348  ;;  %v3246_v18 = vmul.f32 0.6931472, %v4347_v7 }
 0x7ee   :  { %v2865_v54 = vmul.f32 %v3645_v49, %v2826_v50  ;;  %v2866_v55 = vmul.f32 %v3645_v49, %v2827_v51  ;;  %v3248_v19 = vmul.f32 0.6931472, %v4349_v63 }
 0x7ef   :  { %v3308_v29 = vmul.f32 %v5102_v39, %v3246_v18 }
 0x7f0   :  { %v2904_v22 = vadd.f32 %v3646_v53, %v2865_v54  ;;  %v2905_v26 = vadd.f32 %v3646_v53, %v2866_v55  ;;  %v3309_v30 = vmul.f32 %v5102_v39, %v3248_v19  ;;  %v3481_v19 = vstv %s4294_s15 }
 0x7f1   :  { %v3342_v34 = vmul.f32 1.442695, %v3308_v29 }
 0x7f2   :  { %vm2936_vm6 = vcmp.gt.f32.partialorder %v2904_v22, 0.0  ;;  %vm2937_vm7 = vcmp.gt.f32.partialorder %v2905_v26, 0.0  ;;  %v2968_v57 = vmul.f32 0.1, %v2904_v22  ;;  %v2969_v58 = vmul.f32 0.1, %v2905_v26 }
 0x7f3   :  { %v3344_v37 = vmul.f32 1.442695, %v3309_v30 }
 0x7f4   :  { %v3000_v12 = vsel %vm2936_vm6, %v2904_v22, %v2968_v57  ;;  %v3001_v0 = vsel %vm2937_vm7, %v2905_v26, %v2969_v58 }
 0x7f5   :  { %v3064_v21 = vpack.c.bf16 %v3001_v0, %v3000_v12 }
 0x7f7   :  { %v3081_v62 = vunpack.c.l.bf16 %v3064_v21  ;;  %v3082_v9 = vunpack.c.h.bf16 %v3064_v21 }
 0x7f9   :  { %v3113_v20 = vmax.f32 %v3081_v62, 0.0  ;;  %v3114_v23 = vmax.f32 %v3082_v9, 0.0 }
 0x7fb   :  { %v3145_v59 = vmin.f32 %v3113_v20, 100.0  ;;  %v3146_v33 = vmin.f32 %v3114_v23, 100.0 }
 0x7fd   :  { %vm5161_vm8 = vcmp.gt.f32.partialorder %v3145_v59, 0.0  ;;  %vm5165_vm9 = vcmp.gt.f32.partialorder %v3146_v33, 0.0 }
 0x7fe   :  { %v3209_v4 = vsel %vm5161_vm8, %v3145_v59, 1.0  ;;  %v3210_v5 = vsel %vm5165_vm9, %v3146_v33, 1.0 }
 0x7ff   :  { %4350 = vlog2.f32 %v3209_v4 }
 0x800   :  { %4352 = vlog2.f32 %v3210_v5 }
 0x801   :  { %4354 = vpow2.f32 %v3342_v34 }
 0x802   :  { %4356 = vpow2.f32 %v3344_v37 }
 0x809   :  { %v4351_v31 = vpop.eup %4350 }
 0x80a   :  { %v4353_v32 = vpop.eup %4352  ;;  %v3242_v11 = vmul.f32 0.6931472, %v4351_v31 }
 0x80b   :  { %v3244_v35 = vmul.f32 0.6931472, %v4353_v32  ;;  %v4355_v10 = vpop.eup %4354  ;;  %v3502_v32 = vld [vmem:[%s5228_s16] sm:$0x1] }
 0x80c   :  { %v3306_v38 = vmul.f32 %v5102_v39, %v3242_v11  ;;  %v4357_v42 = vpop.eup %4356  ;;  %v3404_v48 = vsel %vm3179_vm4, %v4355_v10, 0.0 }
 0x80d   :  { %v3307_v3 = vmul.f32 %v5102_v39, %v3244_v35  ;;  %v3405_v49 = vsel %vm3180_vm5, %v4357_v42, 0.0 }
 0x80e   :  { %v3338_v40 = vmul.f32 1.442695, %v3306_v38 }
 0x80f   :  { %v3340_v41 = vmul.f32 1.442695, %v3307_v3 }
 0x810   :  { %4358 = vpow2.f32 %v3338_v40 }
 0x811   :  { %4360 = vpow2.f32 %v3340_v41 }
 0x81a   :  { %v4359_v43 = vpop.eup %4358 }
 0x81b   :  { %v4361_v44 = vpop.eup %4360  ;;  %v3402_v45 = vsel %vm5161_vm8, %v4359_v43, 0.0 }
 0x81c   :  { %v3403_v46 = vsel %vm5165_vm9, %v4361_v44, 0.0 }
 0x81d   :  { %v3434_v39 = vadd.f32 %v3403_v46, %v3402_v45 }
 0x81f   :  { %v3435_v50 = vadd.f32 %v3434_v39, %v3404_v48 }
 0x821   :  { %v3436_v51 = vadd.f32 %v3435_v50, %v3405_v49 }
 0x823   :  { %v3437_v53 = vadd.f32 %v3436_v51, %v3404_v48 }
 0x825   :  { %v3438_v54 = vadd.f32 %v3437_v53, %v3405_v49 }
 0x827   :  { %v3439_v55 = vadd.f32 %v3438_v54, %v3404_v48 }
 0x829   :  { %v3440_v22 = vadd.f32 %v3439_v55, %v3405_v49 }
 0x82b   :  { %v3441_v26 = vadd.f32 %v3440_v22, %v3404_v48 }
 0x82d   :  { %v3442_v56 = vadd.f32 %v3441_v26, %v3405_v49 }
 0x82f   :  { %v3443_v57 = vadd.f32 %v3442_v56, %v3404_v48 }
 0x831   :  { %v3444_v58 = vadd.f32 %v3443_v57, %v3405_v49 }
 0x833   :  { %v3445_v24 = vadd.f32 %v3444_v58, %v3404_v48 }
 0x835   :  { %v3446_v12 = vadd.f32 %v3445_v24, %v3405_v49 }
 0x837   :  { %v3447_v0 = vadd.f32 %v3446_v12, %v3404_v48 }
 0x839   :  { %v3448_v21 = vadd.f32 %v3447_v0, %v3405_v49 }
 0x83b   :  { %v3449_v47 = vadd.f32 %v3448_v21, %v3404_v48 }
 0x83d   :  { %v3450_v62 = vadd.f32 %v3449_v47, %v3405_v49 }
 0x83f   :  { %v3451_v9 = vadd.f32 %v3450_v62, %v3404_v48 }
 0x841   :  { %v3452_v20 = vadd.f32 %v3451_v9, %v3405_v49 }
 0x843   :  { %v3453_v52 = vadd.f32 %v3452_v20, %v3404_v48 }
 0x845   :  { %v3454_v23 = vadd.f32 %v3453_v52, %v3405_v49 }
 0x847   :  { %v3455_v25 = vadd.f32 %v3454_v23, %v3404_v48 }
 0x849   :  { %v3456_v27 = vadd.f32 %v3455_v25, %v3405_v49 }
 0x84b   :  { %v3457_v28 = vadd.f32 %v3456_v27, %v3404_v48 }
 0x84d   :  { %v3458_v59 = vadd.f32 %v3457_v28, %v3405_v49 }
 0x84f   :  { %v3459_v33 = vadd.f32 %v3458_v59, %v3404_v48 }
 0x851   :  { %v3460_v60 = vadd.f32 %v3459_v33, %v3405_v49 }
 0x853   :  { %v3461_v36 = vadd.f32 %v3460_v60, %v3404_v48 }
 0x855   :  { %v3462_v1 = vadd.f32 %v3461_v36, %v3405_v49 }
 0x857   :  { %v3463_v2 = vadd.f32 %v3462_v1, %v3404_v48 }
 0x859   :  { %v3464_v4 = vadd.f32 %v3463_v2, %v3405_v49 }
 0x85b   :  { %v3465_v5 = vrot.slane %v3464_v4, 4 }
 0x85d   :  { %v3466_v6 = vadd.f32 %v3465_v5, %v3464_v4 }
 0x85f   :  { %v3467_v7 = vrot.slane %v3466_v6, 2 }
 0x861   :  { %v3468_v63 = vadd.f32 %v3467_v7, %v3466_v6 }
 0x863   :  { %v3469_v8 = vrot.slane %v3468_v63, 1 }
 0x865   :  { %v3470_v14 = vadd.f32 %v3469_v8, %v3468_v63 }
 0x867   :  { %v3471_v13 = vmul.f32 0.0625, %v3470_v14 }
 0x869   :  { %v3472_v15 = vmax.f32 %v3471_v13, 0.0 }
 0x86b   :  { %v3473_v16 = vmin.f32 %v3472_v15, 100.0 }
 0x86d   :  { %vm3477_vm11 = vcmp.gt.f32.partialorder %v3473_v16, 0.0 }
 0x86e   :  { %v3478_v17 = vsel %vm3477_vm11, %v3473_v16, 1.0 }
 0x86f   :  { %4362 = vlog2.f32 %v3478_v17 }
 0x879   :  { %v4363_v18 = vpop.eup %4362 }
 0x87a   :  { %v3480_v61 = vmul.f32 0.6931472, %v4363_v18 }
 0x87c   :  { %v3482_v29 = vmul.f32 %v3481_v19, %v3480_v61 }
 0x87e   :  { %v3483_v30 = vmul.f32 1.442695, %v3482_v29 }
 0x880   :  { %4364 = vpow2.f32 %v3483_v30 }
 0x88a   :  { %v4365_v31 = vpop.eup %4364 }
 0x88b   :  { %4251 = vmatmul.mubr.msk.f32.vlgmr.msra.gmra.mrb[144].mxu0 %vm3477_vm11, %v4365_v31 }
 0x95e   :  { %v3569_v11 = vpop.f32.mrb[144].mxu0 }
 0x95f   :  { %v3570_v34 = vadd.f32 %v3569_v11, %v3502_v32  ;;  %v4252_v35 = vpop.f32.mrb[145].mxu0 }
 0x961   :  { %3573 = vst [vmem:[%s5230_s18] sm:$0x1] %v3570_v34 }
 0x962   :  { %3578 = vsyncmov [#allocation3] }
 0x965   :  { %s3579_s27 = vpop.sfrf %3578 }
 0x966   :  { %p3648_p0 = scmp.ne.s32.totalorder %s3579_s27, 0 }
 0x968   :  { %3583 = shalt.err (%p3648_p0)  }

</bundles_post_ra>
